<compile_context>
chip_gen: v7x
topology: tpu7x:2x2x1
jax: 0.10.0
libtpu: 0.0.40
codegen_flags: <defaults>
</compile_context>

<pallas_src>
import math
from functools import partial

import jax
import jax.numpy as jnp
from jax import lax
from jax.experimental import pallas as pl
from jax.experimental.pallas import tpu as pltpu


def _mhsa_kernel(num_heads, head_dim, eps,
                 x_full_ref, xq_ref, mask_ref,
                 wq_ref, bq_ref, wk_ref, bk_ref, wv_ref, bv_ref,
                 wd_ref, bd_ref, gamma_ref, beta_ref,
                 o_ref,
                 k_sc, v_sc, q_sc, ctx_sc):
    # x_full_ref: (1, S, H) f32   full sequence (only read at qi == 0)
    # xq_ref:     (1, TQ, H) f32  current query tile (residual path)
    # mask_ref:   (1, 1, S) f32   additive mask (0 keep / -1e30 masked)
    # wq/wk/wv/wd:(H, H) bf16     pre-transposed so kernel computes x @ W
    # biases / gamma / beta: (1, H) f32
    # k_sc/v_sc:  (nh, S, hd) bf16 persistent head-major K/V cache
    # q_sc:       (nh, TQ, hd) bf16 ; ctx_sc: (TQ, H) bf16
    qi = pl.program_id(1)

    # ---- K/V projections: once per batch element, full MXU depth H, cached
    #      head-major in VMEM scratch and reused by every query tile.
    @pl.when(qi == 0)
    def _():
        xf = x_full_ref[0].astype(jnp.bfloat16)                        # (S, H)
        k = jnp.dot(xf, wk_ref[...], preferred_element_type=jnp.float32) + bk_ref[...]
        v = jnp.dot(xf, wv_ref[...], preferred_element_type=jnp.float32) + bv_ref[...]
        k = k.astype(jnp.bfloat16)
        v = v.astype(jnp.bfloat16)
        for h in range(num_heads):
            lo = h * head_dim
            k_sc[h] = k[:, lo:lo + head_dim]
            v_sc[h] = v[:, lo:lo + head_dim]

    x_f32 = xq_ref[0]                              # (TQ, H) f32 residual path
    x = x_f32.astype(jnp.bfloat16)
    add_mask = mask_ref[...]                       # (1, 1, S) f32

    # ---- Q projection at full depth; softmax scale is pre-folded into wq/bq.
    q = jnp.dot(x, wq_ref[...], preferred_element_type=jnp.float32) + bq_ref[...]
    q = q.astype(jnp.bfloat16)                     # (TQ, H)
    for h in range(num_heads):
        lo = h * head_dim
        q_sc[h] = q[:, lo:lo + head_dim]           # head-major regroup (data move only)

    # ---- Head-batched attention: dense MXU pushes, no per-head compute chain.
    q3 = q_sc[...]                                 # (nh, TQ, hd) bf16
    k3 = k_sc[...]                                 # (nh, S,  hd) bf16
    v3 = v_sc[...]                                 # (nh, S,  hd) bf16
    s = jnp.einsum("hqd,hkd->hqk", q3, k3,
                   preferred_element_type=jnp.float32)         # (nh, TQ, S) f32
    s = s + add_mask                                           # mask over keys
    s = s - jnp.max(s, axis=-1, keepdims=True)                 # stable softmax
    e = jnp.exp(s)
    p = e * pl.reciprocal(jnp.sum(e, axis=-1, keepdims=True), approx=True)
    ctx = jnp.einsum("hqk,hkd->hqd", p.astype(jnp.bfloat16), v3,
                     preferred_element_type=jnp.float32)       # (nh, TQ, hd) f32

    # ---- Regroup heads to (TQ, H) head-major columns (== torch
    #      transpose(1,2).reshape) and run ONE full-depth output projection.
    ctx16 = ctx.astype(jnp.bfloat16)
    for h in range(num_heads):
        lo = h * head_dim
        ctx_sc[:, lo:lo + head_dim] = ctx16[h]
    y = jnp.dot(ctx_sc[...], wd_ref[...],
                preferred_element_type=jnp.float32) + bd_ref[...]

    # ---- Residual + LayerNorm (f32, biased variance, eps inside sqrt).
    r = y + x_f32
    mu = jnp.mean(r, axis=-1, keepdims=True)
    var = jnp.mean((r - mu) * (r - mu), axis=-1, keepdims=True)
    normed = (r - mu) * lax.rsqrt(var + jnp.float32(eps))
    o_ref[...] = (normed * gamma_ref[...] + beta_ref[...])[None]


def _const_spec(shape):
    """BlockSpec for a grid-invariant (weight/bias) input: constant block index
    so Pallas only DMAs the block once per kernel invocation."""
    n = len(shape)
    return pl.BlockSpec(shape, lambda b, qi: (0,) * n)


def _pick_q_block(seq_len):
    """Largest query tile <= 256 dividing seq_len (sublane-friendly), else full."""
    for cand in (256, 128, 64, 32, 16, 8):
        if cand <= seq_len and seq_len % cand == 0:
            return cand
    return seq_len


def _vmem_limit_bytes():
    """~96 MiB on 128 MiB chips (v5e/v6e), ~48 MiB on 64 MiB v7x."""
    try:
        info = pltpu.get_tpu_info()
        phys = int(getattr(info, "vmem_capacity_bytes", 64 * 1024 * 1024))
    except Exception:
        phys = 64 * 1024 * 1024
    return int(min(96 * 1024 * 1024, phys * 3 // 4))


def pack_mhsa_params(params, num_heads):
    """One-time packing (model init, NOT per forward call): transpose PyTorch
    (out,in) weights to x@W layout, cast to bf16 for the MXU, and fold the
    1/sqrt(head_dim) softmax scale into the Q projection."""
    H = params["wq"].shape[0]
    head_dim = H // num_heads
    scale = jnp.float32(1.0 / math.sqrt(head_dim))
    f32 = jnp.float32
    return {
        "wq": (params["wq"].astype(f32).T * scale).astype(jnp.bfloat16),
        "bq": (params["bq"].astype(f32) * scale).reshape(1, H),
        "wk": params["wk"].astype(f32).T.astype(jnp.bfloat16),
        "bk": params["bk"].astype(f32).reshape(1, H),
        "wv": params["wv"].astype(f32).T.astype(jnp.bfloat16),
        "bv": params["bv"].astype(f32).reshape(1, H),
        "wd": params["wd"].astype(f32).T.astype(jnp.bfloat16),
        "bd": params["bd"].astype(f32).reshape(1, H),
        "gamma": params["gamma"].astype(f32).reshape(1, H),
        "beta": params["beta"].astype(f32).reshape(1, H),
    }


def multi_head_self_attention(hidden_states, attention_mask, packed,
                              num_heads, layer_norm_eps, q_block=None):
    """hidden_states: (B, S, H) f32; attention_mask: (B, S) (1=keep, 0=mask);
    packed: output of pack_mhsa_params."""
    B, S, H = hidden_states.shape
    assert H % num_heads == 0
    head_dim = H // num_heads
    if q_block is None:
        q_block = _pick_q_block(S)
    assert S % q_block == 0
    n_q = S // q_block

    # Additive mask precomputed once; finite large-negative instead of -inf so
    # fully-masked rows give a uniform softmax instead of NaN.
    add_mask = jnp.where(attention_mask == 0,
                         jnp.float32(-1e30), jnp.float32(0.0)).reshape(B, 1, S)

    kernel = partial(_mhsa_kernel, num_heads, head_dim, layer_norm_eps)

    grid_spec = pltpu.PrefetchScalarGridSpec(
        num_scalar_prefetch=0,
        grid=(B, n_q),
        in_specs=[
            pl.BlockSpec((1, S, H), lambda b, qi: (b, 0, 0)),          # x full (K/V)
            pl.BlockSpec((1, q_block, H), lambda b, qi: (b, qi, 0)),   # x query tile
            pl.BlockSpec((1, 1, S), lambda b, qi: (b, 0, 0)),          # additive mask
            _const_spec((H, H)), _const_spec((1, H)),                  # Q
            _const_spec((H, H)), _const_spec((1, H)),                  # K
            _const_spec((H, H)), _const_spec((1, H)),                  # V
            _const_spec((H, H)), _const_spec((1, H)),                  # dense
            _const_spec((1, H)), _const_spec((1, H)),                  # LN gamma/beta
        ],
        out_specs=pl.BlockSpec((1, q_block, H), lambda b, qi: (b, qi, 0)),
        scratch_shapes=[
            pltpu.VMEM((num_heads, S, head_dim), jnp.bfloat16),        # K cache
            pltpu.VMEM((num_heads, S, head_dim), jnp.bfloat16),        # V cache
            pltpu.VMEM((num_heads, q_block, head_dim), jnp.bfloat16),  # Q head-major
            pltpu.VMEM((q_block, H), jnp.bfloat16),                    # regrouped ctx
        ],
    )

    return pl.pallas_call(
        kernel,
        out_shape=jax.ShapeDtypeStruct((B, S, H), jnp.float32),
        grid_spec=grid_spec,
        compiler_params=pltpu.CompilerParams(
            dimension_semantics=("parallel", "arbitrary"),
            vmem_limit_bytes=_vmem_limit_bytes()),
    )(hidden_states, hidden_states, add_mask,
      packed["wq"], packed["bq"], packed["wk"], packed["bk"],
      packed["wv"], packed["bv"], packed["wd"], packed["bd"],
      packed["gamma"], packed["beta"])


def _reference(hidden_states, attention_mask, params, num_heads, eps):
    """Pure-JAX f32 reference mirroring the PyTorch forward (eval mode)."""
    B, S, H = hidden_states.shape
    hd = H // num_heads
    x = hidden_states
    q = x @ params["wq"].T + params["bq"]
    k = x @ params["wk"].T + params["bk"]
    v = x @ params["wv"].T + params["bv"]

    def split(t):
        return t.reshape(B, S, num_heads, hd).transpose(0, 2, 1, 3)

    q, k, v = split(q), split(k), split(v)
    m = attention_mask.astype(jnp.float32)
    m = jnp.where(m == 0, -jnp.inf, 0.0)[:, None, None, :]
    s = (q @ k.transpose(0, 1, 3, 2)) * (1.0 / math.sqrt(hd)) + m
    p = jax.nn.softmax(s, axis=-1)
    av = (p @ v).transpose(0, 2, 1, 3).reshape(B, S, H)
    y = av @ params["wd"].T + params["bd"]
    r = y + x
    mu = r.mean(-1, keepdims=True)
    var = ((r - mu) ** 2).mean(-1, keepdims=True)
    return (r - mu) / jnp.sqrt(var + eps) * params["gamma"] + params["beta"]


if __name__ == "__main__":
    B, S, H = 2, 8, 32
    num_heads = 4
    layer_norm_eps = 1e-12

    key = jax.random.PRNGKey(0)
    ks = jax.random.split(key, 10)

    params = {
        "wq": 0.05 * jax.random.normal(ks[0], (H, H), jnp.float32),
        "bq": 0.01 * jax.random.normal(ks[1], (H,), jnp.float32),
        "wk": 0.05 * jax.random.normal(ks[2], (H, H), jnp.float32),
        "bk": 0.01 * jax.random.normal(ks[3], (H,), jnp.float32),
        "wv": 0.05 * jax.random.normal(ks[4], (H, H), jnp.float32),
        "bv": 0.01 * jax.random.normal(ks[5], (H,), jnp.float32),
        "wd": 0.05 * jax.random.normal(ks[6], (H, H), jnp.float32),
        "bd": 0.01 * jax.random.normal(ks[7], (H,), jnp.float32),
        "gamma": jnp.ones((H,), jnp.float32),
        "beta": jnp.zeros((H,), jnp.float32),
    }

    hidden_states = jax.random.normal(ks[8], (B, S, H), jnp.float32)
    # mask: batch 0 fully attended, batch 1 masks the last 3 tokens
    attention_mask = jnp.ones((B, S), jnp.int32).at[1, S - 3:].set(0)

    # One-time weight packing ("model init"), outside the per-call path.
    packed = pack_mhsa_params(params, num_heads)

    out = multi_head_self_attention(hidden_states, attention_mask, packed,
                                    num_heads, layer_norm_eps)
    out = jax.block_until_ready(out)

    ref = _reference(hidden_states, attention_mask, params, num_heads,
                     layer_norm_eps)
    assert out.shape == (B, S, H)
    # bf16 matmuls + approx reciprocal vs. an f32 reference -> loosened tolerance.
    assert jnp.allclose(out, ref, atol=2e-2, rtol=2e-2), "mismatch vs reference"

    print("KERNEL_OK")
</pallas_src>

<mosaic_0001>
module attributes {stable_mosaic.version = 11 : i64} {
  func.func @_mhsa_kernel(%arg0: i32, %arg1: i32, %arg2: memref<1x8x32xf32, #tpu.memory_space<vmem>>, %arg3: memref<1x8x32xf32, #tpu.memory_space<vmem>>, %arg4: memref<1x1x8xf32, #tpu.memory_space<vmem>>, %arg5: memref<32x32xbf16, #tpu.memory_space<vmem>>, %arg6: memref<1x32xf32, #tpu.memory_space<vmem>>, %arg7: memref<32x32xbf16, #tpu.memory_space<vmem>>, %arg8: memref<1x32xf32, #tpu.memory_space<vmem>>, %arg9: memref<32x32xbf16, #tpu.memory_space<vmem>>, %arg10: memref<1x32xf32, #tpu.memory_space<vmem>>, %arg11: memref<32x32xbf16, #tpu.memory_space<vmem>>, %arg12: memref<1x32xf32, #tpu.memory_space<vmem>>, %arg13: memref<1x32xf32, #tpu.memory_space<vmem>>, %arg14: memref<1x32xf32, #tpu.memory_space<vmem>>, %arg15: memref<1x8x32xf32, #tpu.memory_space<vmem>>, %arg16: memref<4x8x8xbf16, #tpu.memory_space<vmem>>, %arg17: memref<4x8x8xbf16, #tpu.memory_space<vmem>>, %arg18: memref<4x8x8xbf16, #tpu.memory_space<vmem>>, %arg19: memref<8x32xbf16, #tpu.memory_space<vmem>>) attributes {dimension_semantics = [#tpu.dimension_semantics<parallel>, #tpu.dimension_semantics<arbitrary>], iteration_bounds = array<i64: 2, 1>, scalar_prefetch = 0 : i64, scratch_operands = 4 : i64, tpu.core_type = #tpu.core_type<tc>, window_params = [{transform_indices = @transform_0, window_bounds = array<i64: 1, 8, 32>}, {transform_indices = @transform_1, window_bounds = array<i64: 1, 8, 32>}, {transform_indices = @transform_2, window_bounds = array<i64: 1, 1, 8>}, {pipeline_mode = #tpu.pipeline_mode<synchronous>, transform_indices = @transform_3, window_bounds = array<i64: 32, 32>}, {pipeline_mode = #tpu.pipeline_mode<synchronous>, transform_indices = @transform_4, window_bounds = array<i64: 1, 32>}, {pipeline_mode = #tpu.pipeline_mode<synchronous>, transform_indices = @transform_5, window_bounds = array<i64: 32, 32>}, {pipeline_mode = #tpu.pipeline_mode<synchronous>, transform_indices = @transform_6, window_bounds = array<i64: 1, 32>}, {pipeline_mode = #tpu.pipeline_mode<synchronous>, transform_indices = @transform_7, window_bounds = array<i64: 32, 32>}, {pipeline_mode = #tpu.pipeline_mode<synchronous>, transform_indices = @transform_8, window_bounds = array<i64: 1, 32>}, {pipeline_mode = #tpu.pipeline_mode<synchronous>, transform_indices = @transform_9, window_bounds = array<i64: 32, 32>}, {pipeline_mode = #tpu.pipeline_mode<synchronous>, transform_indices = @transform_10, window_bounds = array<i64: 1, 32>}, {pipeline_mode = #tpu.pipeline_mode<synchronous>, transform_indices = @transform_11, window_bounds = array<i64: 1, 32>}, {pipeline_mode = #tpu.pipeline_mode<synchronous>, transform_indices = @transform_12, window_bounds = array<i64: 1, 32>}, {transform_indices = @transform_13, window_bounds = array<i64: 1, 8, 32>}]} {
    %c0_i32 = arith.constant 0 : i32
    %0 = arith.cmpi eq, %arg1, %c0_i32 : i32
    %1 = arith.extui %0 : i1 to i32
    %c0_i32_0 = arith.constant 0 : i32
    %2 = arith.cmpi ne, %1, %c0_i32_0 : i32
    scf.if %2 {
      %c0_56 = arith.constant 0 : index
      %c0_57 = arith.constant 0 : index
      %c0_58 = arith.constant 0 : index
      %95 = vector.load %arg2[%c0_56, %c0_57, %c0_58] : memref<1x8x32xf32, #tpu.memory_space<vmem>>, vector<1x8x32xf32>
      %96 = vector.shape_cast %95 : vector<1x8x32xf32> to vector<8x32xf32>
      %97 = arith.truncf %96 : vector<8x32xf32> to vector<8x32xbf16>
      %c0_59 = arith.constant 0 : index
      %c0_60 = arith.constant 0 : index
      %98 = vector.load %arg7[%c0_59, %c0_60] : memref<32x32xbf16, #tpu.memory_space<vmem>>, vector<32x32xbf16>
      %cst_61 = arith.constant dense<0.000000e+00> : vector<8x32xf32>
      %99 = tpu.matmul %97, %98, %cst_61 {dimension_numbers = #tpu.dot_dimension_numbers<[1], [0], [0], [1], [0, 0, 1, 1], [], []>} : vector<8x32xbf16>, vector<32x32xbf16>, vector<8x32xf32> -> vector<8x32xf32>
      %c0_62 = arith.constant 0 : index
      %c0_63 = arith.constant 0 : index
      %100 = vector.load %arg8[%c0_62, %c0_63] : memref<1x32xf32, #tpu.memory_space<vmem>>, vector<1x32xf32>
      %101 = vector.broadcast %100 : vector<1x32xf32> to vector<8x32xf32>
      %102 = arith.addf %99, %101 : vector<8x32xf32>
      %c0_64 = arith.constant 0 : index
      %c0_65 = arith.constant 0 : index
      %103 = vector.load %arg9[%c0_64, %c0_65] : memref<32x32xbf16, #tpu.memory_space<vmem>>, vector<32x32xbf16>
      %cst_66 = arith.constant dense<0.000000e+00> : vector<8x32xf32>
      %104 = tpu.matmul %97, %103, %cst_66 {dimension_numbers = #tpu.dot_dimension_numbers<[1], [0], [0], [1], [0, 0, 1, 1], [], []>} : vector<8x32xbf16>, vector<32x32xbf16>, vector<8x32xf32> -> vector<8x32xf32>
      %c0_67 = arith.constant 0 : index
      %c0_68 = arith.constant 0 : index
      %105 = vector.load %arg10[%c0_67, %c0_68] : memref<1x32xf32, #tpu.memory_space<vmem>>, vector<1x32xf32>
      %106 = vector.broadcast %105 : vector<1x32xf32> to vector<8x32xf32>
      %107 = arith.addf %104, %106 : vector<8x32xf32>
      %108 = arith.truncf %102 : vector<8x32xf32> to vector<8x32xbf16>
      %109 = arith.truncf %107 : vector<8x32xf32> to vector<8x32xbf16>
      %110 = vector.extract_strided_slice %108 {offsets = [0, 0], sizes = [8, 8], strides = [1, 1]} : vector<8x32xbf16> to vector<8x8xbf16>
      %c0_69 = arith.constant 0 : index
      %c0_70 = arith.constant 0 : index
      %c0_71 = arith.constant 0 : index
      %111 = vector.load %arg16[%c0_69, %c0_70, %c0_71] : memref<4x8x8xbf16, #tpu.memory_space<vmem>>, vector<1x8x8xbf16>
      %112 = vector.shape_cast %111 : vector<1x8x8xbf16> to vector<8x8xbf16>
      %113 = vector.shape_cast %110 : vector<8x8xbf16> to vector<1x8x8xbf16>
      tpu.vector_store %arg16[%c0_69, %c0_70, %c0_71], %113 {strides = array<i32>} : memref<4x8x8xbf16, #tpu.memory_space<vmem>>, vector<1x8x8xbf16>,
      %114 = vector.extract_strided_slice %109 {offsets = [0, 0], sizes = [8, 8], strides = [1, 1]} : vector<8x32xbf16> to vector<8x8xbf16>
      %c0_72 = arith.constant 0 : index
      %c0_73 = arith.constant 0 : index
      %c0_74 = arith.constant 0 : index
      %115 = vector.load %arg17[%c0_72, %c0_73, %c0_74] : memref<4x8x8xbf16, #tpu.memory_space<vmem>>, vector<1x8x8xbf16>
      %116 = vector.shape_cast %115 : vector<1x8x8xbf16> to vector<8x8xbf16>
      %117 = vector.shape_cast %114 : vector<8x8xbf16> to vector<1x8x8xbf16>
      tpu.vector_store %arg17[%c0_72, %c0_73, %c0_74], %117 {strides = array<i32>} : memref<4x8x8xbf16, #tpu.memory_space<vmem>>, vector<1x8x8xbf16>,
      %118 = vector.extract_strided_slice %108 {offsets = [0, 8], sizes = [8, 8], strides = [1, 1]} : vector<8x32xbf16> to vector<8x8xbf16>
      %c1_75 = arith.constant 1 : index
      %c0_76 = arith.constant 0 : index
      %c0_77 = arith.constant 0 : index
      %119 = vector.load %arg16[%c1_75, %c0_76, %c0_77] : memref<4x8x8xbf16, #tpu.memory_space<vmem>>, vector<1x8x8xbf16>
      %120 = vector.shape_cast %119 : vector<1x8x8xbf16> to vector<8x8xbf16>
      %121 = vector.shape_cast %118 : vector<8x8xbf16> to vector<1x8x8xbf16>
      tpu.vector_store %arg16[%c1_75, %c0_76, %c0_77], %121 {strides = array<i32>} : memref<4x8x8xbf16, #tpu.memory_space<vmem>>, vector<1x8x8xbf16>,
      %122 = vector.extract_strided_slice %109 {offsets = [0, 8], sizes = [8, 8], strides = [1, 1]} : vector<8x32xbf16> to vector<8x8xbf16>
      %c1_78 = arith.constant 1 : index
      %c0_79 = arith.constant 0 : index
      %c0_80 = arith.constant 0 : index
      %123 = vector.load %arg17[%c1_78, %c0_79, %c0_80] : memref<4x8x8xbf16, #tpu.memory_space<vmem>>, vector<1x8x8xbf16>
      %124 = vector.shape_cast %123 : vector<1x8x8xbf16> to vector<8x8xbf16>
      %125 = vector.shape_cast %122 : vector<8x8xbf16> to vector<1x8x8xbf16>
      tpu.vector_store %arg17[%c1_78, %c0_79, %c0_80], %125 {strides = array<i32>} : memref<4x8x8xbf16, #tpu.memory_space<vmem>>, vector<1x8x8xbf16>,
      %126 = vector.extract_strided_slice %108 {offsets = [0, 16], sizes = [8, 8], strides = [1, 1]} : vector<8x32xbf16> to vector<8x8xbf16>
      %c2_81 = arith.constant 2 : index
      %c0_82 = arith.constant 0 : index
      %c0_83 = arith.constant 0 : index
      %127 = vector.load %arg16[%c2_81, %c0_82, %c0_83] : memref<4x8x8xbf16, #tpu.memory_space<vmem>>, vector<1x8x8xbf16>
      %128 = vector.shape_cast %127 : vector<1x8x8xbf16> to vector<8x8xbf16>
      %129 = vector.shape_cast %126 : vector<8x8xbf16> to vector<1x8x8xbf16>
      tpu.vector_store %arg16[%c2_81, %c0_82, %c0_83], %129 {strides = array<i32>} : memref<4x8x8xbf16, #tpu.memory_space<vmem>>, vector<1x8x8xbf16>,
      %130 = vector.extract_strided_slice %109 {offsets = [0, 16], sizes = [8, 8], strides = [1, 1]} : vector<8x32xbf16> to vector<8x8xbf16>
      %c2_84 = arith.constant 2 : index
      %c0_85 = arith.constant 0 : index
      %c0_86 = arith.constant 0 : index
      %131 = vector.load %arg17[%c2_84, %c0_85, %c0_86] : memref<4x8x8xbf16, #tpu.memory_space<vmem>>, vector<1x8x8xbf16>
      %132 = vector.shape_cast %131 : vector<1x8x8xbf16> to vector<8x8xbf16>
      %133 = vector.shape_cast %130 : vector<8x8xbf16> to vector<1x8x8xbf16>
      tpu.vector_store %arg17[%c2_84, %c0_85, %c0_86], %133 {strides = array<i32>} : memref<4x8x8xbf16, #tpu.memory_space<vmem>>, vector<1x8x8xbf16>,
      %134 = vector.extract_strided_slice %108 {offsets = [0, 24], sizes = [8, 8], strides = [1, 1]} : vector<8x32xbf16> to vector<8x8xbf16>
      %c3_87 = arith.constant 3 : index
      %c0_88 = arith.constant 0 : index
      %c0_89 = arith.constant 0 : index
      %135 = vector.load %arg16[%c3_87, %c0_88, %c0_89] : memref<4x8x8xbf16, #tpu.memory_space<vmem>>, vector<1x8x8xbf16>
      %136 = vector.shape_cast %135 : vector<1x8x8xbf16> to vector<8x8xbf16>
      %137 = vector.shape_cast %134 : vector<8x8xbf16> to vector<1x8x8xbf16>
      tpu.vector_store %arg16[%c3_87, %c0_88, %c0_89], %137 {strides = array<i32>} : memref<4x8x8xbf16, #tpu.memory_space<vmem>>, vector<1x8x8xbf16>,
      %138 = vector.extract_strided_slice %109 {offsets = [0, 24], sizes = [8, 8], strides = [1, 1]} : vector<8x32xbf16> to vector<8x8xbf16>
      %c3_90 = arith.constant 3 : index
      %c0_91 = arith.constant 0 : index
      %c0_92 = arith.constant 0 : index
      %139 = vector.load %arg17[%c3_90, %c0_91, %c0_92] : memref<4x8x8xbf16, #tpu.memory_space<vmem>>, vector<1x8x8xbf16>
      %140 = vector.shape_cast %139 : vector<1x8x8xbf16> to vector<8x8xbf16>
      %141 = vector.shape_cast %138 : vector<8x8xbf16> to vector<1x8x8xbf16>
      tpu.vector_store %arg17[%c3_90, %c0_91, %c0_92], %141 {strides = array<i32>} : memref<4x8x8xbf16, #tpu.memory_space<vmem>>, vector<1x8x8xbf16>,
    } else {
    }
    %c0 = arith.constant 0 : index
    %c0_1 = arith.constant 0 : index
    %c0_2 = arith.constant 0 : index
    %3 = vector.load %arg3[%c0, %c0_1, %c0_2] : memref<1x8x32xf32, #tpu.memory_space<vmem>>, vector<1x8x32xf32>
    %4 = vector.shape_cast %3 : vector<1x8x32xf32> to vector<8x32xf32>
    %5 = arith.truncf %4 : vector<8x32xf32> to vector<8x32xbf16>
    %c0_3 = arith.constant 0 : index
    %c0_4 = arith.constant 0 : index
    %c0_5 = arith.constant 0 : index
    %6 = vector.load %arg4[%c0_3, %c0_4, %c0_5] : memref<1x1x8xf32, #tpu.memory_space<vmem>>, vector<1x1x8xf32>
    %c0_6 = arith.constant 0 : index
    %c0_7 = arith.constant 0 : index
    %7 = vector.load %arg5[%c0_6, %c0_7] : memref<32x32xbf16, #tpu.memory_space<vmem>>, vector<32x32xbf16>
    %cst = arith.constant dense<0.000000e+00> : vector<8x32xf32>
    %8 = tpu.matmul %5, %7, %cst {dimension_numbers = #tpu.dot_dimension_numbers<[1], [0], [0], [1], [0, 0, 1, 1], [], []>} : vector<8x32xbf16>, vector<32x32xbf16>, vector<8x32xf32> -> vector<8x32xf32>
    %c0_8 = arith.constant 0 : index
    %c0_9 = arith.constant 0 : index
    %9 = vector.load %arg6[%c0_8, %c0_9] : memref<1x32xf32, #tpu.memory_space<vmem>>, vector<1x32xf32>
    %10 = vector.broadcast %9 : vector<1x32xf32> to vector<8x32xf32>
    %11 = arith.addf %8, %10 : vector<8x32xf32>
    %12 = arith.truncf %11 : vector<8x32xf32> to vector<8x32xbf16>
    %13 = vector.extract_strided_slice %12 {offsets = [0, 0], sizes = [8, 8], strides = [1, 1]} : vector<8x32xbf16> to vector<8x8xbf16>
    %c0_10 = arith.constant 0 : index
    %c0_11 = arith.constant 0 : index
    %c0_12 = arith.constant 0 : index
    %14 = vector.load %arg18[%c0_10, %c0_11, %c0_12] : memref<4x8x8xbf16, #tpu.memory_space<vmem>>, vector<1x8x8xbf16>
    %15 = vector.shape_cast %14 : vector<1x8x8xbf16> to vector<8x8xbf16>
    %16 = vector.shape_cast %13 : vector<8x8xbf16> to vector<1x8x8xbf16>
    tpu.vector_store %arg18[%c0_10, %c0_11, %c0_12], %16 {strides = array<i32>} : memref<4x8x8xbf16, #tpu.memory_space<vmem>>, vector<1x8x8xbf16>,
    %17 = vector.extract_strided_slice %12 {offsets = [0, 8], sizes = [8, 8], strides = [1, 1]} : vector<8x32xbf16> to vector<8x8xbf16>
    %c1 = arith.constant 1 : index
    %c0_13 = arith.constant 0 : index
    %c0_14 = arith.constant 0 : index
    %18 = vector.load %arg18[%c1, %c0_13, %c0_14] : memref<4x8x8xbf16, #tpu.memory_space<vmem>>, vector<1x8x8xbf16>
    %19 = vector.shape_cast %18 : vector<1x8x8xbf16> to vector<8x8xbf16>
    %20 = vector.shape_cast %17 : vector<8x8xbf16> to vector<1x8x8xbf16>
    tpu.vector_store %arg18[%c1, %c0_13, %c0_14], %20 {strides = array<i32>} : memref<4x8x8xbf16, #tpu.memory_space<vmem>>, vector<1x8x8xbf16>,
    %21 = vector.extract_strided_slice %12 {offsets = [0, 16], sizes = [8, 8], strides = [1, 1]} : vector<8x32xbf16> to vector<8x8xbf16>
    %c2 = arith.constant 2 : index
    %c0_15 = arith.constant 0 : index
    %c0_16 = arith.constant 0 : index
    %22 = vector.load %arg18[%c2, %c0_15, %c0_16] : memref<4x8x8xbf16, #tpu.memory_space<vmem>>, vector<1x8x8xbf16>
    %23 = vector.shape_cast %22 : vector<1x8x8xbf16> to vector<8x8xbf16>
    %24 = vector.shape_cast %21 : vector<8x8xbf16> to vector<1x8x8xbf16>
    tpu.vector_store %arg18[%c2, %c0_15, %c0_16], %24 {strides = array<i32>} : memref<4x8x8xbf16, #tpu.memory_space<vmem>>, vector<1x8x8xbf16>,
    %25 = vector.extract_strided_slice %12 {offsets = [0, 24], sizes = [8, 8], strides = [1, 1]} : vector<8x32xbf16> to vector<8x8xbf16>
    %c3 = arith.constant 3 : index
    %c0_17 = arith.constant 0 : index
    %c0_18 = arith.constant 0 : index
    %26 = vector.load %arg18[%c3, %c0_17, %c0_18] : memref<4x8x8xbf16, #tpu.memory_space<vmem>>, vector<1x8x8xbf16>
    %27 = vector.shape_cast %26 : vector<1x8x8xbf16> to vector<8x8xbf16>
    %28 = vector.shape_cast %25 : vector<8x8xbf16> to vector<1x8x8xbf16>
    tpu.vector_store %arg18[%c3, %c0_17, %c0_18], %28 {strides = array<i32>} : memref<4x8x8xbf16, #tpu.memory_space<vmem>>, vector<1x8x8xbf16>,
    %c0_19 = arith.constant 0 : index
    %c0_20 = arith.constant 0 : index
    %c0_21 = arith.constant 0 : index
    %29 = vector.load %arg18[%c0_19, %c0_20, %c0_21] : memref<4x8x8xbf16, #tpu.memory_space<vmem>>, vector<4x8x8xbf16>
    %c0_22 = arith.constant 0 : index
    %c0_23 = arith.constant 0 : index
    %c0_24 = arith.constant 0 : index
    %30 = vector.load %arg16[%c0_22, %c0_23, %c0_24] : memref<4x8x8xbf16, #tpu.memory_space<vmem>>, vector<4x8x8xbf16>
    %c0_25 = arith.constant 0 : index
    %c0_26 = arith.constant 0 : index
    %c0_27 = arith.constant 0 : index
    %31 = vector.load %arg17[%c0_25, %c0_26, %c0_27] : memref<4x8x8xbf16, #tpu.memory_space<vmem>>, vector<4x8x8xbf16>
    "tpu.trace_start"() <{level = 10 : i32, message = "hqd,hkd->hqk"}> : () -> ()
    %cst_28 = arith.constant dense<0.000000e+00> : vector<4x8x8xf32>
    %32 = tpu.matmul %29, %30, %cst_28 {dimension_numbers = #tpu.dot_dimension_numbers<[2], [2], [1], [1], [0, 0, 0, 1, 1, 1], [0], [0]>} : vector<4x8x8xbf16>, vector<4x8x8xbf16>, vector<4x8x8xf32> -> vector<4x8x8xf32>
    "tpu.trace_stop"() : () -> ()
    %33 = vector.broadcast %6 : vector<1x1x8xf32> to vector<4x8x8xf32>
    %34 = arith.addf %32, %33 : vector<4x8x8xf32>
    %cst_29 = arith.constant dense<0xFF800000> : vector<4x8xf32>
    %35 = vector.multi_reduction <maximumf>, %34, %cst_29 [2] : vector<4x8x8xf32> to vector<4x8xf32>
    %36 = vector.shape_cast %35 : vector<4x8xf32> to vector<4x8x1xf32>
    %37 = vector.broadcast %36 : vector<4x8x1xf32> to vector<4x8x8xf32>
    %38 = arith.subf %34, %37 : vector<4x8x8xf32>
    %39 = math.exp %38 : vector<4x8x8xf32>
    %cst_30 = arith.constant dense<0.000000e+00> : vector<4x8xf32>
    %40 = vector.multi_reduction <add>, %39, %cst_30 [2] : vector<4x8x8xf32> to vector<4x8xf32>
    %41 = vector.shape_cast %40 : vector<4x8xf32> to vector<4x8x1xf32>
    %42 = tpu.reciprocal %41 {approx = true} : vector<4x8x1xf32> -> vector<4x8x1xf32>
    %43 = vector.broadcast %42 : vector<4x8x1xf32> to vector<4x8x8xf32>
    %44 = arith.mulf %39, %43 : vector<4x8x8xf32>
    %45 = arith.truncf %44 : vector<4x8x8xf32> to vector<4x8x8xbf16>
    "tpu.trace_start"() <{level = 10 : i32, message = "hqk,hkd->hqd"}> : () -> ()
    %cst_31 = arith.constant dense<0.000000e+00> : vector<4x8x8xf32>
    %46 = tpu.matmul %45, %31, %cst_31 {dimension_numbers = #tpu.dot_dimension_numbers<[2], [1], [1], [2], [0, 0, 0, 1, 1, 2], [0], [0]>} : vector<4x8x8xbf16>, vector<4x8x8xbf16>, vector<4x8x8xf32> -> vector<4x8x8xf32>
    "tpu.trace_stop"() : () -> ()
    %47 = arith.truncf %46 : vector<4x8x8xf32> to vector<4x8x8xbf16>
    %48 = vector.extract_strided_slice %47 {offsets = [0, 0, 0], sizes = [1, 8, 8], strides = [1, 1, 1]} : vector<4x8x8xbf16> to vector<1x8x8xbf16>
    %49 = vector.shape_cast %48 : vector<1x8x8xbf16> to vector<8x8xbf16>
    %c0_32 = arith.constant 0 : index
    %c0_33 = arith.constant 0 : index
    %50 = vector.load %arg19[%c0_32, %c0_33] : memref<8x32xbf16, #tpu.memory_space<vmem>>, vector<8x8xbf16>
    tpu.vector_store %arg19[%c0_32, %c0_33], %49 {strides = array<i32>} : memref<8x32xbf16, #tpu.memory_space<vmem>>, vector<8x8xbf16>,
    %51 = vector.extract_strided_slice %47 {offsets = [1, 0, 0], sizes = [1, 8, 8], strides = [1, 1, 1]} : vector<4x8x8xbf16> to vector<1x8x8xbf16>
    %52 = vector.shape_cast %51 : vector<1x8x8xbf16> to vector<8x8xbf16>
    %c0_34 = arith.constant 0 : index
    %c8 = arith.constant 8 : index
    %53 = vector.load %arg19[%c0_34, %c8] : memref<8x32xbf16, #tpu.memory_space<vmem>>, vector<8x8xbf16>
    tpu.vector_store %arg19[%c0_34, %c8], %52 {strides = array<i32>} : memref<8x32xbf16, #tpu.memory_space<vmem>>, vector<8x8xbf16>,
    %54 = vector.extract_strided_slice %47 {offsets = [2, 0, 0], sizes = [1, 8, 8], strides = [1, 1, 1]} : vector<4x8x8xbf16> to vector<1x8x8xbf16>
    %55 = vector.shape_cast %54 : vector<1x8x8xbf16> to vector<8x8xbf16>
    %c0_35 = arith.constant 0 : index
    %c16 = arith.constant 16 : index
    %56 = vector.load %arg19[%c0_35, %c16] : memref<8x32xbf16, #tpu.memory_space<vmem>>, vector<8x8xbf16>
    tpu.vector_store %arg19[%c0_35, %c16], %55 {strides = array<i32>} : memref<8x32xbf16, #tpu.memory_space<vmem>>, vector<8x8xbf16>,
    %57 = vector.extract_strided_slice %47 {offsets = [3, 0, 0], sizes = [1, 8, 8], strides = [1, 1, 1]} : vector<4x8x8xbf16> to vector<1x8x8xbf16>
    %58 = vector.shape_cast %57 : vector<1x8x8xbf16> to vector<8x8xbf16>
    %c0_36 = arith.constant 0 : index
    %c24 = arith.constant 24 : index
    %59 = vector.load %arg19[%c0_36, %c24] : memref<8x32xbf16, #tpu.memory_space<vmem>>, vector<8x8xbf16>
    tpu.vector_store %arg19[%c0_36, %c24], %58 {strides = array<i32>} : memref<8x32xbf16, #tpu.memory_space<vmem>>, vector<8x8xbf16>,
    %c0_37 = arith.constant 0 : index
    %c0_38 = arith.constant 0 : index
    %60 = vector.load %arg19[%c0_37, %c0_38] : memref<8x32xbf16, #tpu.memory_space<vmem>>, vector<8x32xbf16>
    %c0_39 = arith.constant 0 : index
    %c0_40 = arith.constant 0 : index
    %61 = vector.load %arg11[%c0_39, %c0_40] : memref<32x32xbf16, #tpu.memory_space<vmem>>, vector<32x32xbf16>
    %cst_41 = arith.constant dense<0.000000e+00> : vector<8x32xf32>
    %62 = tpu.matmul %60, %61, %cst_41 {dimension_numbers = #tpu.dot_dimension_numbers<[1], [0], [0], [1], [0, 0, 1, 1], [], []>} : vector<8x32xbf16>, vector<32x32xbf16>, vector<8x32xf32> -> vector<8x32xf32>
    %c0_42 = arith.constant 0 : index
    %c0_43 = arith.constant 0 : index
    %63 = vector.load %arg12[%c0_42, %c0_43] : memref<1x32xf32, #tpu.memory_space<vmem>>, vector<1x32xf32>
    %64 = vector.broadcast %63 : vector<1x32xf32> to vector<8x32xf32>
    %65 = arith.addf %62, %64 : vector<8x32xf32>
    %66 = arith.addf %65, %4 : vector<8x32xf32>
    %cst_44 = arith.constant dense<0.000000e+00> : vector<8xf32>
    %67 = vector.multi_reduction <add>, %66, %cst_44 [1] : vector<8x32xf32> to vector<8xf32>
    %68 = vector.shape_cast %67 : vector<8xf32> to vector<8x1xf32>
    %cst_45 = arith.constant 3.200000e+01 : f32
    %69 = vector.broadcast %cst_45 : f32 to vector<8x1xf32>
    %70 = arith.divf %68, %69 : vector<8x1xf32>
    %71 = vector.broadcast %70 : vector<8x1xf32> to vector<8x32xf32>
    %72 = arith.subf %66, %71 : vector<8x32xf32>
    %73 = vector.broadcast %70 : vector<8x1xf32> to vector<8x32xf32>
    %74 = arith.subf %66, %73 : vector<8x32xf32>
    %75 = arith.mulf %72, %74 : vector<8x32xf32>
    %cst_46 = arith.constant dense<0.000000e+00> : vector<8xf32>
    %76 = vector.multi_reduction <add>, %75, %cst_46 [1] : vector<8x32xf32> to vector<8xf32>
    %77 = vector.shape_cast %76 : vector<8xf32> to vector<8x1xf32>
    %cst_47 = arith.constant 3.200000e+01 : f32
    %78 = vector.broadcast %cst_47 : f32 to vector<8x1xf32>
    %79 = arith.divf %77, %78 : vector<8x1xf32>
    %80 = vector.broadcast %70 : vector<8x1xf32> to vector<8x32xf32>
    %81 = arith.subf %66, %80 : vector<8x32xf32>
    %cst_48 = arith.constant 9.99999996E-13 : f32
    %82 = vector.broadcast %cst_48 : f32 to vector<8x1xf32>
    %83 = arith.addf %79, %82 : vector<8x1xf32>
    %84 = math.rsqrt %83 : vector<8x1xf32>
    %85 = vector.broadcast %84 : vector<8x1xf32> to vector<8x32xf32>
    %86 = arith.mulf %81, %85 : vector<8x32xf32>
    %c0_49 = arith.constant 0 : index
    %c0_50 = arith.constant 0 : index
    %87 = vector.load %arg13[%c0_49, %c0_50] : memref<1x32xf32, #tpu.memory_space<vmem>>, vector<1x32xf32>
    %88 = vector.broadcast %87 : vector<1x32xf32> to vector<8x32xf32>
    %89 = arith.mulf %86, %88 : vector<8x32xf32>
    %c0_51 = arith.constant 0 : index
    %c0_52 = arith.constant 0 : index
    %90 = vector.load %arg14[%c0_51, %c0_52] : memref<1x32xf32, #tpu.memory_space<vmem>>, vector<1x32xf32>
    %91 = vector.broadcast %90 : vector<1x32xf32> to vector<8x32xf32>
    %92 = arith.addf %89, %91 : vector<8x32xf32>
    %93 = vector.shape_cast %92 : vector<8x32xf32> to vector<1x8x32xf32>
    %c0_53 = arith.constant 0 : index
    %c0_54 = arith.constant 0 : index
    %c0_55 = arith.constant 0 : index
    %94 = vector.load %arg15[%c0_53, %c0_54, %c0_55] : memref<1x8x32xf32, #tpu.memory_space<vmem>>, vector<1x8x32xf32>
    tpu.vector_store %arg15[%c0_53, %c0_54, %c0_55], %93 {strides = array<i32>} : memref<1x8x32xf32, #tpu.memory_space<vmem>>, vector<1x8x32xf32>,
    return
  }
  func.func @transform_0(%arg0: i32, %arg1: i32) -> (i32, i32, i32) {
    %c0_i32 = arith.constant 0 : i32
    %c0_i32_0 = arith.constant 0 : i32
    %c0_i32_1 = arith.constant 0 : i32
    return %arg0, %c0_i32, %c0_i32_0 : i32, i32, i32
  }
  func.func @transform_1(%arg0: i32, %arg1: i32) -> (i32, i32, i32) {
    %c0_i32 = arith.constant 0 : i32
    %c0_i32_0 = arith.constant 0 : i32
    return %arg0, %arg1, %c0_i32 : i32, i32, i32
  }
  func.func @transform_2(%arg0: i32, %arg1: i32) -> (i32, i32, i32) {
    %c0_i32 = arith.constant 0 : i32
    %c0_i32_0 = arith.constant 0 : i32
    %c0_i32_1 = arith.constant 0 : i32
    return %arg0, %c0_i32, %c0_i32_0 : i32, i32, i32
  }
  func.func @transform_3(%arg0: i32, %arg1: i32) -> (i32, i32) {
    %c0_i32 = arith.constant 0 : i32
    %c0_i32_0 = arith.constant 0 : i32
    %c0_i32_1 = arith.constant 0 : i32
    return %c0_i32, %c0_i32_0 : i32, i32
  }
  func.func @transform_4(%arg0: i32, %arg1: i32) -> (i32, i32) {
    %c0_i32 = arith.constant 0 : i32
    %c0_i32_0 = arith.constant 0 : i32
    %c0_i32_1 = arith.constant 0 : i32
    return %c0_i32, %c0_i32_0 : i32, i32
  }
  func.func @transform_5(%arg0: i32, %arg1: i32) -> (i32, i32) {
    %c0_i32 = arith.constant 0 : i32
    %c0_i32_0 = arith.constant 0 : i32
    %c0_i32_1 = arith.constant 0 : i32
    return %c0_i32, %c0_i32_0 : i32, i32
  }
  func.func @transform_6(%arg0: i32, %arg1: i32) -> (i32, i32) {
    %c0_i32 = arith.constant 0 : i32
    %c0_i32_0 = arith.constant 0 : i32
    %c0_i32_1 = arith.constant 0 : i32
    return %c0_i32, %c0_i32_0 : i32, i32
  }
  func.func @transform_7(%arg0: i32, %arg1: i32) -> (i32, i32) {
    %c0_i32 = arith.constant 0 : i32
    %c0_i32_0 = arith.constant 0 : i32
    %c0_i32_1 = arith.constant 0 : i32
    return %c0_i32, %c0_i32_0 : i32, i32
  }
  func.func @transform_8(%arg0: i32, %arg1: i32) -> (i32, i32) {
    %c0_i32 = arith.constant 0 : i32
    %c0_i32_0 = arith.constant 0 : i32
    %c0_i32_1 = arith.constant 0 : i32
    return %c0_i32, %c0_i32_0 : i32, i32
  }
  func.func @transform_9(%arg0: i32, %arg1: i32) -> (i32, i32) {
    %c0_i32 = arith.constant 0 : i32
    %c0_i32_0 = arith.constant 0 : i32
    %c0_i32_1 = arith.constant 0 : i32
    return %c0_i32, %c0_i32_0 : i32, i32
  }
  func.func @transform_10(%arg0: i32, %arg1: i32) -> (i32, i32) {
    %c0_i32 = arith.constant 0 : i32
    %c0_i32_0 = arith.constant 0 : i32
    %c0_i32_1 = arith.constant 0 : i32
    return %c0_i32, %c0_i32_0 : i32, i32
  }
  func.func @transform_11(%arg0: i32, %arg1: i32) -> (i32, i32) {
    %c0_i32 = arith.constant 0 : i32
    %c0_i32_0 = arith.constant 0 : i32
    %c0_i32_1 = arith.constant 0 : i32
    return %c0_i32, %c0_i32_0 : i32, i32
  }
  func.func @transform_12(%arg0: i32, %arg1: i32) -> (i32, i32) {
    %c0_i32 = arith.constant 0 : i32
    %c0_i32_0 = arith.constant 0 : i32
    %c0_i32_1 = arith.constant 0 : i32
    return %c0_i32, %c0_i32_0 : i32, i32
  }
  func.func @transform_13(%arg0: i32, %arg1: i32) -> (i32, i32, i32) {
    %c0_i32 = arith.constant 0 : i32
    %c0_i32_0 = arith.constant 0 : i32
    return %arg0, %arg1, %c0_i32 : i32, i32, i32
  }
}

</mosaic_0001>

<bundles_post_ra>
// kernel: tpu_custom_call.1
= control target key start
LH: loop header
LB: loop body
LE: loop exit
PB: predicated region body
PF: predicated region fallthrough
CT: control target
= control target key end

     0   :  { %s2803_s0 = inlined_call_operand.hbm [shape: f32[2,8,32], index: 0, kind: input, shape index: {}]   ;;  %s2804_s1 = inlined_call_operand.hbm [shape: f32[2,8,32], index: 1, kind: input, shape index: {}]   ;;  %s2805_s2 = inlined_call_operand.vmem [shape: f32[2,1,8], index: 2, kind: input, shape index: {}]   ;;  %s2806_s3 = inlined_call_operand.hbm [shape: bf16[32,32], index: 3, kind: input, shape index: {}]   ;;  %s2807_s4 = inlined_call_operand.hbm [shape: f32[1,32], index: 4, kind: input, shape index: {}]   ;;  %s2808_s5 = inlined_call_operand.vmem [shape: bf16[32,32], index: 5, kind: input, shape index: {}]   ;;  %s2809_s6 = inlined_call_operand.hbm [shape: f32[1,32], index: 6, kind: input, shape index: {}]   ;;  %s2810_s7 = inlined_call_operand.hbm [shape: bf16[32,32], index: 7, kind: input, shape index: {}]   ;;  %s2811_s8 = inlined_call_operand.hbm [shape: f32[1,32], index: 8, kind: input, shape index: {}]   ;;  %s2812_s9 = inlined_call_operand.vmem [shape: bf16[32,32], index: 9, kind: input, shape index: {}]   ;;  %s2813_s10 = inlined_call_operand.vmem [shape: f32[1,32], index: 10, kind: input, shape index: {}]   ;;  %s2814_s11 = inlined_call_operand.vmem [shape: f32[1,32], index: 11, kind: input, shape index: {}]   ;;  %s2815_s12 = inlined_call_operand.vmem [shape: f32[1,32], index: 12, kind: input, shape index: {}]   ;;  %s2816_s13 = inlined_call_operand.hbm [shape: f32[2,8,32], index: 13, kind: output, shape index: {}]  }
   0x1   :  { %2824 = sst [smem:[#allocation26_spill]] %s2805_s2 }
   0x2   :  { %2825 = sst [smem:[#allocation27_spill]] %s2806_s3 }
   0x3   :  { %2826 = sst [smem:[#allocation28_spill]] %s2807_s4 }
   0x4   :  { %2827 = sst [smem:[#allocation29_spill]] %s2809_s6 }
   0x5   :  { %2828 = sst [smem:[#allocation30_spill]] %s2810_s7 }
   0x6   :  { %2829 = sst [smem:[#allocation31_spill]] %s2811_s8 }
   0x7   :  { %2830 = sst [smem:[#allocation32_spill]] %s2812_s9 }
   0x8   :  { %2831 = sst [smem:[#allocation33_spill]] %s2813_s10 }
   0x9   :  { %2832 = sst [smem:[#allocation34_spill]] %s2814_s11 }
   0xa   :  { %2833 = sst [smem:[#allocation35_spill]] %s2815_s12 }
   0xb   :  { %2834 = sst [smem:[#allocation36_spill]] %s2816_s13 }
   0xc   :  { %18 = vsyncpa [#allocation7], 0 }
   0xd   :  { %20 = vsyncpa [#allocation7 + $0x1], 0 }
   0xe   :  { %21 = vsyncpa [#allocation10], 0 }
   0xf   :  { %23 = vsyncpa [#allocation10 + $0x1], 0 }
  0x10   :  { %24 = vsyncpa [#allocation13], 0 }
  0x11   :  { %25 = vsyncpa [#allocation16], 0 }
  0x12   :  { %26 = vsyncpa [#allocation8], 0 }
  0x13   :  { %28 = vsyncpa [#allocation8 + $0x1], 0  ;;  %s2312_s25 = smov 0   ;;  %s2314_s26 = smov 0  }
  0x14   :  { %s2316_s27 = smov 0   ;;  %s2318_s28 = smov 0  }
  0x15   :  { %s2320_s29 = smov 0   ;;  %s2322_s30 = smov 0  }
  0x16 LB: > { %2835 = sst [smem:[#allocation25_spill]] %s2214_s28  ;;  %s2343_s14 = sadd.s32 4294967295, %s2222_s30   ;;  %s2222_s30 = sphi %s2322_s30, %s34_s30   ;;  %s2218_s29 = sphi %s2320_s29, %s2872_s29   ;;  %s2214_s28 = sphi %s2318_s28, %s2871_s28   ;;  %s2210_s27 = sphi %s2316_s27, %s2870_s27   ;;  %s2206_s26 = sphi %s2314_s26, %s2869_s26   ;;  %s2202_s25 = sphi %s2312_s25, %s2868_s25  }
  0x17   : > { %p1599_p0 = scmp.ge.s32.totalorder %s2222_s30, 1  ;;  %p2820_p1 = scmp.eq.s32.totalorder %s2343_s14, 0 }
  0x18   : > { %p369_p2 = scmp.lt.s32.totalorder %s2222_s30, 3  ;;  %s2224_s16 = smov [#allocation11]  }
  0x19   : > { %s381_s17 = sshll.u32 %s2224_s16, 4  ;;  %s2225_s19 = smov [#allocation12]   ;;  %s2352_s17 = int_to_ptr.vmem [resolvable:$true] %s381_s17 }
  0x1a   : > { %p2348_p3 = pnand %p1599_p0, %p369_p2  ;;  %s395_s20 = sshll.u32 %s2225_s19, 4  ;;  %s2363_s20 = int_to_ptr.vmem [resolvable:$true] %s395_s20 }
  0x1b   : > { %s2226_s21 = smov [#allocation15]   ;;  %s2838_s3 = sld [smem:[#allocation27_spill]] }
  0x1c   : > { %s2836_s15 = scalar_select %p2348_p3, 1, 0 }
  0x1d   : > { %p1796_p4 = pneg %p2348_p3  ;;  %s2365_s22 = sshll.u32 %s2226_s21, 4  ;;  %s420_s22 = int_to_ptr.vmem [resolvable:$true] %s2365_s22 }
  0x1f   : > { %p2359_p6 = pnand %p1796_p4, %p2820_p1 }
  0x21   : > { %s1924_s16 = scalar_lea.hbm %s2838_s3, 256  ;;  %p2375_p8 = pneg %p2359_p6 }
  0x22   : > { %p1925_p7 = scmp.ne.s32.totalorder %s2838_s3, %s1924_s16  ;;  %p1931_p11 = scmp.lt.u32.totalorder %s1924_s16, %s2838_s3 }
  0x24   : > { %p1927_p9 = pnand %p2375_p8, %p1925_p7 }
  0x26   : > { %p1928_p10 = pneg %p1927_p9 }
  0x28   : > { %p1933_p12 = pnand %p1931_p11, %p1928_p10 }
  0x2a   : > { %1936 = shalt.err (!%p1933_p12)
}
  0x2b   : > { %s1937_s12 = scalar_lea.vmem %s2352_s17, 256  ;;  %p1945_p4 = scmp.lt.s32.totalorder %s2352_s17, %s2352_s17 }
  0x2c   : > { %p1938_p13 = scmp.ne.s32.totalorder %s2352_s17, %s1937_s12  ;;  %p1946_p5 = scmp.lt.s32.totalorder %s1937_s12, %s1937_s12 }
  0x2e   : > { %p1940_p0 = pnand %p1938_p13, %p2375_p8  ;;  %p1947_p7 = por %p1946_p5, %p1945_p4 }
  0x30   : > { %p1941_p2 = pneg %p1940_p0 }
  0x32   : > { %p1948_p9 = pnand %p1947_p7, %p1941_p2 }
  0x34   : > { %1951 = shalt.err (!%p1948_p9)
}
  0x35   : > { %s2227_s13 = smov 64   ;;  %s2228_s23 = smov 4  }
  0x36   : > { %1799 = dma.hbm_to_vmem [thread:$0]  (!%p2359_p6), %s2838_s3, 256, %s2352_s17, [#allocation10], %s2227_s13, %s2227_s13, %s2228_s23  }
  0x37   : > { %s2840_s4 = sld [smem:[#allocation28_spill]] }
  0x3d   : > { %s1952_s12 = scalar_lea.hbm %s2840_s4, 16 }
  0x3e   : > { %p1953_p5 = scmp.ne.s32.totalorder %s2840_s4, %s1952_s12  ;;  %p1959_p12 = scmp.lt.u32.totalorder %s1952_s12, %s2840_s4 }
  0x40   : > { %p1955_p10 = pnand %p1953_p5, %p2375_p8 }
  0x42   : > { %p1956_p11 = pneg %p1955_p10 }
  0x44   : > { %p1961_p13 = pnand %p1959_p12, %p1956_p11 }
  0x46   : > { %1964 = shalt.err (!%p1961_p13)
}
  0x47   : > { %s1965_s17 = scalar_lea.vmem %s2363_s20, 16  ;;  %s1972_s9 = scalar_lea.vmem %s2363_s20, 32 }
  0x48   : > { %p1966_p0 = scmp.ne.s32.totalorder %s2363_s20, %s1965_s17  ;;  %p1973_p7 = scmp.lt.s32.totalorder %s2363_s20, %s2363_s20 }
  0x49   : > { %p1974_p9 = scmp.lt.s32.totalorder %s1972_s9, %s1965_s17 }
  0x4a   : > { %p1968_p2 = pnand %p1966_p0, %p2375_p8 }
  0x4b   : > { %p1975_p5 = por %p1974_p9, %p1973_p7 }
  0x4c   : > { %p1969_p4 = pneg %p1968_p2 }
  0x4e   : > { %p1976_p10 = pnand %p1975_p5, %p1969_p4 }
  0x50   : > { %1979 = shalt.err (!%p1976_p10)
}
  0x51   : > { %1802 = dma.hbm_to_vmem [thread:$0]  (!%p2359_p6), %s2840_s4, 16, %s2363_s20, [#allocation13]  }
  0x52   : > { %s2841_s7 = sld [smem:[#allocation30_spill]] }
  0x58   : > { %s1980_s16 = scalar_lea.hbm %s2841_s7, 256 }
  0x59   : > { %p1981_p11 = scmp.ne.s32.totalorder %s2841_s7, %s1980_s16  ;;  %p1987_p0 = scmp.lt.u32.totalorder %s1980_s16, %s2841_s7 }
  0x5b   : > { %p1983_p12 = pnand %p1981_p11, %p2375_p8 }
  0x5d   : > { %p1984_p13 = pneg %p1983_p12 }
  0x5f   : > { %p1989_p2 = pnand %p1987_p0, %p1984_p13 }
  0x61   : > { %1992 = shalt.err (!%p1989_p2)
}
  0x62   : > { %s1993_s9 = scalar_lea.vmem %s420_s22, 256  ;;  %p2001_p5 = scmp.lt.s32.totalorder %s420_s22, %s420_s22 }
  0x63   : > { %p1994_p4 = scmp.ne.s32.totalorder %s420_s22, %s1993_s9  ;;  %p2002_p10 = scmp.lt.s32.totalorder %s1993_s9, %s1993_s9 }
  0x65   : > { %p1996_p7 = pnand %p1994_p4, %p2375_p8  ;;  %p2003_p1 = por %p2002_p10, %p2001_p5 }
  0x67   : > { %p1997_p9 = pneg %p1996_p7 }
  0x69   : > { %p2004_p3 = pnand %p2003_p1, %p1997_p9 }
  0x6b   : > { %2007 = shalt.err (!%p2004_p3)
}
  0x6c   : > { %1808 = dma.hbm_to_vmem [thread:$0]  (!%p2359_p6), %s2841_s7, 256, %s420_s22, [#allocation16], %s2227_s13, %s2227_s13, %s2228_s23  }
  0x6d   : > { %s2229_s10 = smov [#allocation14]   ;;  %s2230_s24 = smov [#allocation17]  }
  0x6e   : > { %s409_s28 = sshll.u32 %s2229_s10, 4  ;;  %s433_s16 = sshll.u32 %s2230_s24, 4  ;;  %s410_s28 = int_to_ptr.vmem [resolvable:$true] %s409_s28  ;;  %s434_s16 = int_to_ptr.vmem [resolvable:$true] %s433_s16 }
  0x6f   : > { %s2842_s6 = sld [smem:[#allocation29_spill]] }
  0x75   : > { %s2008_s12 = scalar_lea.hbm %s2842_s6, 16 }
  0x76   : > { %p2009_p1 = scmp.ne.s32.totalorder %s2842_s6, %s2008_s12  ;;  %p2015_p12 = scmp.lt.u32.totalorder %s2008_s12, %s2842_s6 }
  0x78   : > { %p2011_p3 = pnand %p2009_p1, %p2375_p8 }
  0x7a   : > { %p2012_p11 = pneg %p2011_p3 }
  0x7c   : > { %p2017_p13 = pnand %p2015_p12, %p2012_p11 }
  0x7e   : > { %2020 = shalt.err (!%p2017_p13)
}
  0x7f   : > { %s2021_s22 = scalar_lea.vmem %s410_s28, 16  ;;  %s2028_s13 = scalar_lea.vmem %s410_s28, 32 }
  0x80   : > { %p2022_p0 = scmp.ne.s32.totalorder %s410_s28, %s2021_s22  ;;  %p2029_p7 = scmp.lt.s32.totalorder %s410_s28, %s410_s28 }
  0x81   : > { %p2030_p9 = scmp.lt.s32.totalorder %s2028_s13, %s2021_s22 }
  0x82   : > { %p2024_p2 = pnand %p2022_p0, %p2375_p8 }
  0x83   : > { %p2031_p5 = por %p2030_p9, %p2029_p7 }
  0x84   : > { %p2025_p4 = pneg %p2024_p2 }
  0x86   : > { %p2032_p10 = pnand %p2031_p5, %p2025_p4 }
  0x88   : > { %2035 = shalt.err (!%p2032_p10)
}
  0x89   : > { %1805 = dma.hbm_to_vmem [thread:$0]  (!%p2359_p6), %s2842_s6, 16, %s410_s28, [#allocation13]  }
  0x8a   : > { %s2843_s8 = sld [smem:[#allocation31_spill]] }
  0x90   : > { %s2036_s24 = scalar_lea.hbm %s2843_s8, 16 }
  0x91   : > { %p2037_p1 = scmp.ne.s32.totalorder %s2843_s8, %s2036_s24  ;;  %p2043_p12 = scmp.lt.u32.totalorder %s2036_s24, %s2843_s8 }
  0x93   : > { %p2039_p3 = pnand %p2037_p1, %p2375_p8 }
  0x95   : > { %p2040_p11 = pneg %p2039_p3 }
  0x97   : > { %p2045_p13 = pnand %p2043_p12, %p2040_p11 }
  0x99   : > { %2048 = shalt.err (!%p2045_p13)
}
  0x9a   : > { %s2049_s9 = scalar_lea.vmem %s434_s16, 16  ;;  %s2056_s28 = scalar_lea.vmem %s434_s16, 32 }
  0x9b   : > { %p2050_p0 = scmp.ne.s32.totalorder %s434_s16, %s2049_s9  ;;  %p2057_p7 = scmp.lt.s32.totalorder %s434_s16, %s434_s16 }
  0x9c   : > { %p2058_p9 = scmp.lt.s32.totalorder %s2056_s28, %s2049_s9 }
  0x9d   : > { %p2052_p2 = pnand %p2050_p0, %p2375_p8 }
  0x9e   : > { %p2059_p5 = por %p2058_p9, %p2057_p7 }
  0x9f   : > { %p2053_p4 = pneg %p2052_p2 }
  0xa1   : > { %p2060_p10 = pnand %p2059_p5, %p2053_p4 }
  0xa3   : > { %2063 = shalt.err (!%p2060_p10)
}
  0xa4   : > { %1811 = dma.hbm_to_vmem [thread:$0]  (!%p2359_p6), %s2843_s8, 16, %s434_s16, [#allocation16]  }
  0xa5   : > { %s1598_s11 = sadd.s32 4294967294, %s2222_s30   ;;  %s46_s13 = sadd.s32 1, %s2218_s29 }
  0xa6   : > { %s53_s18 = sadd.s32 1, %s2210_s27  ;;  %p48_p8 = scmp.ge.s32.totalorder %s46_s13, 2 }
  0xa7   : > { %p60_p1 = scmp.ne.s32.totalorder %s2210_s27, %s2206_s26  ;;  %p61_p3 = scmp.eq.s32.totalorder %s2222_s30, 0 }
  0xa8   : > { %p66_p11 = scmp.ne.s32.totalorder %s2206_s26, %s2202_s25  ;;  %s2874_s13 = smov (%p48_p8, %s46_s13), 0 }
  0xa9   : > { %p2491_p12 = por %p61_p3, %p60_p1  ;;  %p2845_p13 = scmp.eq.s32.totalorder %s2343_s14, 0 }
  0xaa   : > { %s50_s2 = ssub.s32 %s2218_s29, %s2874_s13  ;;  %p356_p0 = scmp.eq.s32.totalorder %s2343_s14, 1 }
  0xab   : > { %p2497_p6 = por %p2845_p13, %p66_p11  ;;  %p51_p2 = scmp.eq.s32.totalorder %s50_s2, 0 }
  0xac   : > { %p362_p4 = scmp.eq.s32.totalorder %s1598_s11, 1  ;;  %p2504_p7 = por %p356_p0, %p60_p1 }
  0xad   : > { %s2846_s16 = scalar_select %p2497_p6, 1, 0 }
  0xae   : > { %s2847_s3 = scalar_select %p2504_p7, 1, 0 }
  0xaf   : > { %p1828_p9 = scmp.lt.s32.totalorder %s2222_s30, 2  ;;  %p2512_p5 = por %p362_p4, %p66_p11 }
  0xb0   : > { %s2510_s10 = scalar_select %p51_p2, %s2210_s27, %s53_s18  }
  0xb1   : > { %s2848_s24 = scalar_select %p2512_p5, 1, 0 }
  0xb2   : > { %s456_s19 = sand.u32 1, %s2210_s27   ;;  %s1607_s12 = sshll.u32 %s2218_s29, 7 }
  0xb3   : > { %s2517_s21 = sshll.u32 %s456_s19, 3  ;;  %s2523_s28 = scalar_lea.hbm %s2803_s0, %s1607_s12 }
  0xb4   : > { %s460_s20 = scalar_lea.vmem [#allocation6], %s2517_s21  ;;  %p2530_p10 = pnand %p1828_p9, %p2491_p12 }
  0xb5   : > { %s467_s22 = sshll.u32 %s460_s20, 4  ;;  %s2537_s17 = scalar_lea.hbm %s2804_s1, %s1607_s12  ;;  %s2526_s22 = int_to_ptr.vmem [resolvable:$true] %s467_s22 }
  0xb6   : > { %s474_s9 = sand.u32 1, %s2222_s30   ;;  %s457_s4 = scalar_lea.sflag [#allocation7], %s456_s19 }
  0xb7   : > { %s2064_s6 = scalar_lea.hbm %s2523_s28, 128  ;;  %p2066_p1 = pneg %p2530_p10 }
  0xb8   : > { %p2065_p8 = scmp.ne.s32.totalorder %s2523_s28, %s2064_s6  ;;  %s2069_s7 = scalar_lea.hbm %s2803_s0, 256 }
  0xb9   : > { %p2070_p12 = scmp.lt.u32.totalorder %s2523_s28, %s2803_s0  ;;  %p2071_p13 = scmp.lt.u32.totalorder %s2069_s7, %s2064_s6 }
  0xba   : > { %p2067_p3 = pnand %p2066_p1, %p2065_p8  ;;  %p2073_p2 = scmp.lt.u32.totalorder %s2064_s6, %s2523_s28 }
  0xbb   : > { %p2072_p0 = por %p2071_p13, %p2070_p12 }
  0xbc   : > { %p2068_p11 = pneg %p2067_p3 }
  0xbd   : > { %p2074_p4 = por %p2073_p2, %p2072_p0 }
  0xbf   : > { %p2075_p9 = pnand %p2074_p4, %p2068_p11 }
  0xc1   : > { %2078 = shalt.err (!%p2075_p9)
}
  0xc2   : > { %s2079_s19 = scalar_lea.vmem %s2526_s22, 128  ;;  %s2231_s12 = smov [#allocation6]  }
  0xc3   : > { %p2080_p8 = scmp.ne.s32.totalorder %s2526_s22, %s2079_s19  ;;  %s2084_s2 = sshll.u32 %s2231_s12, 4  ;;  %s2085_s2 = int_to_ptr.vmem [resolvable:$false] %s2084_s2 }
  0xc4   : > { %s2086_s8 = scalar_lea.vmem %s2085_s2, 256  ;;  %p2087_p7 = scmp.lt.s32.totalorder %s2526_s22, %s2085_s2 }
  0xc5   : > { %p2082_p3 = pnand %p2080_p8, %p2066_p1  ;;  %p2088_p12 = scmp.lt.s32.totalorder %s2086_s8, %s2079_s19 }
  0xc7   : > { %p2083_p5 = pneg %p2082_p3  ;;  %p2089_p13 = por %p2088_p12, %p2087_p7 }
  0xc9   : > { %p2090_p0 = pnand %p2089_p13, %p2083_p5 }
  0xcb   : > { %2093 = shalt.err (!%p2090_p0)
}
  0xcc   : > { %1815 = dma.hbm_to_vmem [thread:$0]  (!%p2530_p10), %s2523_s28, 128, %s2526_s22, %s457_s4  }
  0xcd   : > { %s478_s6 = scalar_lea.vmem [#allocation9], %s2517_s21  ;;  %s475_s23 = scalar_lea.sflag [#allocation10], %s474_s9 }
  0xce   : > { %s486_s7 = sshll.u32 %s478_s6, 4  ;;  %s2094_s20 = scalar_lea.hbm %s2537_s17, 128  ;;  %s487_s7 = int_to_ptr.vmem [resolvable:$true] %s486_s7 }
  0xcf   : > { %p2095_p7 = scmp.ne.s32.totalorder %s2537_s17, %s2094_s20  ;;  %s2099_s12 = scalar_lea.hbm %s2804_s1, 256 }
  0xd0   : > { %p2100_p2 = scmp.lt.u32.totalorder %s2537_s17, %s2804_s1  ;;  %p2101_p4 = scmp.lt.u32.totalorder %s2099_s12, %s2094_s20 }
  0xd1   : > { %p2097_p5 = pnand %p2095_p7, %p2066_p1  ;;  %p2103_p8 = scmp.lt.u32.totalorder %s2094_s20, %s2537_s17 }
  0xd2   : > { %p2102_p9 = por %p2101_p4, %p2100_p2 }
  0xd3   : > { %p2098_p11 = pneg %p2097_p5 }
  0xd4   : > { %p2104_p3 = por %p2103_p8, %p2102_p9 }
  0xd6   : > { %p2105_p12 = pnand %p2104_p3, %p2098_p11 }
  0xd8   : > { %2108 = shalt.err (!%p2105_p12)
}
  0xd9   : > { %s2109_s4 = scalar_lea.vmem %s487_s7, 128  ;;  %s2232_s21 = smov [#allocation9]  }
  0xda   : > { %p2110_p13 = scmp.ne.s32.totalorder %s487_s7, %s2109_s4  ;;  %s2114_s28 = sshll.u32 %s2232_s21, 4  ;;  %s2115_s28 = int_to_ptr.vmem [resolvable:$false] %s2114_s28 }
  0xdb   : > { %s2116_s22 = scalar_lea.vmem %s2115_s28, 256  ;;  %p2117_p5 = scmp.lt.s32.totalorder %s487_s7, %s2115_s28 }
  0xdc   : > { %p2112_p0 = pnand %p2110_p13, %p2066_p1  ;;  %p2118_p6 = scmp.lt.s32.totalorder %s2116_s22, %s2109_s4 }
  0xde   : > { %p2113_p7 = pneg %p2112_p0  ;;  %p2119_p2 = por %p2118_p6, %p2117_p5 }
  0xe0   : > { %p2120_p4 = pnand %p2119_p2, %p2113_p7 }
  0xe2   : > { %2123 = shalt.err (!%p2120_p4)
}
  0xe3   : > { %1818 = dma.hbm_to_vmem [thread:$0]  (!%p2530_p10), %s2537_s17, 128, %s487_s7, %s475_s23  }
  0xe4   : > { %p2850_p11 = scmp.ne.s32.totalorder %s2836_s15, 0 }
  0xe5   : > { %s2590_s9 = sand.u32 (!%p2850_p11), 1, %s2206_s26   ;;  %p2851_p6 = scmp.ne.s32.totalorder (!%p2850_p11), %s2846_s16, 0 }
  0xe6   : > { %501 = sbr.rel (%p2850_p11) target bundleno = 2028 (0x7ec), region = 72  ;;  %s2593_s6 = sshll.u32 (!%p2850_p11), %s2590_s9, 3 }
  0xe7   : > { %s504_s20 = scalar_lea.sflag (!%p2850_p11), [#allocation7], %s2590_s9  ;;  %s507_s18 = scalar_lea.vmem (!%p2850_p11), [#allocation6], %s2593_s6 }
  0xed   : > { %2177 = dma.done.wait (%p2851_p6), %s504_s20, 128  }
  0xee   : > { %2179 = vsyncadd (%p2851_p6), %s504_s20, 4294967168  ;;  %s512_s15 = sand.u32 1, %s2343_s14   ;;  %s516_s17 = scalar_lea.vmem [#allocation9], %s2593_s6 }
  0xef   : > { %s513_s11 = scalar_lea.sflag [#allocation10], %s512_s15 }
  0xf0   : > { %2181 = dma.done.wait (%p2851_p6), %s513_s11, 128  }
  0xf1   : > { %2183 = vsyncadd (%p2851_p6), %s513_s11, 4294967168  ;;  %p2852_p10 = scmp.eq.s32.totalorder %s2343_s14, 0 }
  0xf3   : > { %2185 = dma.done.wait (%p2852_p10), [#allocation10], 256   ;;  %p2853_p1 = pmov %p2852_p10 }
  0xf5   : > { %2187 = vsyncadd (%p2853_p1), [#allocation10], 4294967040  ;;  %p2854_p9 = pmov %p2853_p1 }
  0xf6   : > { %p2855_p8 = pmov %p2853_p1 }
  0xf7   : > { %2189 = dma.done.wait (%p2854_p9), [#allocation13], 32  }
  0xf8   : > { %2191 = vsyncadd (%p2855_p8), [#allocation13], 4294967264  ;;  %p2856_p3 = pmov %p2853_p1 }
  0xf9   : > { %p2857_p12 = pmov %p2853_p1 }
  0xfa   : > { %2193 = dma.done.wait (%p2856_p3), [#allocation16], 272  }
  0xfb   : > { %2195 = vsyncadd (%p2857_p12), [#allocation16], 4294967024  ;;  %v2233_v0 = vmov 0.0   ;;  %vm2234_vm0 = vmmov 0   ;;  %v1898_v1 = vld [vmem:[%s2808_s5] sm:$0xff]   ;;  %v1899_v2 = vld [vmem:[%s2808_s5 + $0x8] sm:$0xff]  }
  0xfc   : > { %1690 = vmatprep.subr.bf16.mxu0 %v2233_v0  ;;  %1694 = vmatprep.mubr.msk.bf16.mxu0 %vm2234_vm0, %v2233_v0  ;;  %v595_v3 = vld [vmem:[%s507_s18] sm:$0xff]  ;;  %vm620_vm1 = vcmask 261120   ;;  %v2636_v7 = vld [vmem:[%s516_s17] sm:$0xff]  ;;  %vm729_vm2 = vcmask 60416   ;;  %s2235_s14 = smov 104   ;;  %s2236_s12 = smov 120  }
  0xfd   : > { %1698 = vmatprep.subr.bf16.mxu1 %v2233_v0  ;;  %1702 = vmatprep.mubr.msk.bf16.mxu1 %vm2234_vm0, %v2233_v0  ;;  %v1900_v4 = vld [vmem:[#allocation11] sm:$0xff]   ;;  %v596_v5 = vpack.c.bf16 %v595_v3, %v595_v3  ;;  %v1901_v6 = vld [vmem:[#allocation11 + $0x8] sm:$0xff]   ;;  %v769_v8 = vpack.c.bf16 %v2636_v7, %v2636_v7  ;;  %v1902_v9 = vld [vmem:[#allocation15] sm:$0xff]   ;;  %s2237_s2 = smov 112   ;;  %vm877_vm3 = vcmask 64512   ;;  %s2858_s8 = sld [smem:[#allocation25_spill]] }
  0xfe   : > { %1691 = vmatpush3.bf16.msra.mxu0 %v1898_v1  ;;  %1699 = vmatpush3.bf16.msra.mxu1 %v1902_v9  ;;  %v1903_v10 = vld [vmem:[#allocation15 + $0x8] sm:$0xff]   ;;  %v1619_v11 = vld [vmem:[#allocation14] ss:$0 sm:$0xff]  ;;  %v1629_v18 = vld [vmem:[#allocation12] ss:$0 sm:$0xff]  ;;  %vm1113_vm4 = vcmask 1043456  }
  0xff   : > { %1692 = vmatprep.subr.bf16.mxu0 %v2233_v0  ;;  %1700 = vmatprep.subr.bf16.mxu1 %v2233_v0  ;;  %v1623_v28 = vld [vmem:[#allocation17] ss:$0 sm:$0xff]  ;;  %s2859_s22 = sld [smem:[#allocation26_spill]]  ;;  %s2860_s11 = sld [smem:[#allocation32_spill]]  ;;  %vm1306_vm5 = vcmask 126016   ;;  %vm1314_vm6 = vcmask 191616  }
 0x100   : > { %s2238_s7 = smov 8   ;;  %s2239_s23 = smov 24   ;;  %vm1322_vm7 = vcmask 257216  }
 0x101   : > { %s2240_s19 = smov 16   ;;  %s2862_s28 = sld [smem:[#allocation34_spill]] }
 0x102   : > { %1693 = vmatpush3.bf16.msra.mxu0 %v1899_v2  ;;  %1701 = vmatpush3.bf16.msra.mxu1 %v1903_v10  ;;  %s2863_s18 = sld [smem:[#allocation35_spill]]  ;;  %s586_s17 = scalar_lea.vmem [#allocation18], %s2593_s6 }
 0x103   : > { %1706 = vmatprep.subr.bf16.mxu0 %v2233_v0  ;;  %1714 = vmatprep.subr.bf16.mxu1 %v2233_v0  ;;  %p587_p13 = scmp.lt.s32.totalorder %s2858_s8, 1  ;;  %s1653_s15 = sshll.u32 %s2858_s8, 7 }
 0x104   : > { %s1438_s16 = sshll.u32 %s586_s17, 4  ;;  %p2865_p7 = scmp.ne.s32.totalorder %s2847_s3, 0  ;;  %s2755_s16 = int_to_ptr.vmem [resolvable:$true] %s1438_s16 }
 0x105   : > { %1695 = vmatmul.mubr.msk.bf16.vlgmr.msra.gmra.mrb[0].mxu0 %vm620_vm1, %v596_v5  ;;  %1703 = vmatmul.mubr.msk.bf16.vlgmr.msra.gmra.mrb[0].mxu1 %vm620_vm1, %v596_v5  ;;  %s588_s4 = scalar_select %p587_p13, %s2858_s8, 1 }
 0x106   : > { %1707 = vmatpush3.bf16.msra.mxu0 %v1900_v4  ;;  %1710 = vmatprep.mubr.msk.bf16.mxu0 %vm2234_vm0, %v2233_v0  ;;  %s2241_s6 = smov [#allocation18]  }
 0x107   : > { %1708 = vmatprep.subr.bf16.mxu0 %v2233_v0  ;;  %1716 = vmatprep.mubr.msk.bf16.mxu1 %vm2234_vm0, %v2233_v0  ;;  %s589_s20 = scalar_lea.vmem %s2859_s22, %s588_s4  ;;  %s2128_s8 = sshll.u32 %s2241_s6, 4  ;;  %s2129_s8 = int_to_ptr.vmem [resolvable:$false] %s2128_s8 }
 0x108   : > { %v1634_v52 = vld [vmem:[%s589_s20] ss:$0 sm:$0xff]  ;;  %s2130_s4 = scalar_lea.vmem %s2129_s8, 256  ;;  %p2131_p4 = scmp.lt.s32.totalorder %s2755_s16, %s2129_s8 }
 0x10a   : > { %1709 = vmatpush3.bf16.msra.mxu0 %v1901_v6 }
 0x10b   : > { %1720 = vmatprep.subr.bf16.mxu0 %v2233_v0 }
 0x10d   : > { %1711 = vmatmul.mubr.msk.bf16.vlgmr.msra.gmra.mrb[4].mxu0 %vm620_vm1, %v769_v8 }
 0x10e   : > { %1722 = vmatprep.mubr.msk.bf16.mxu0 %vm2234_vm0, %v2233_v0 }
 0x1d8   : > { %v658_v12 = vpop.f32.mrb[0].mxu0  ;;  %v721_v29 = vpop.f32.mrb[0].mxu1 }
 0x1d9   : > { %v659_v13 = vadd.f32 %v1619_v11, %v658_v12  ;;  %v1696_v14 = vpop.f32.mrb[1].mxu0  ;;  %v722_v30 = vadd.f32 %v1623_v28, %v721_v29  ;;  %v1704_v31 = vpop.f32.mrb[1].mxu1 }
 0x1da   : > { %v661_v15 = vpop.f32.mrb[2].mxu0  ;;  %v724_v32 = vpop.f32.mrb[2].mxu1 }
 0x1db   : > { %v727_v16 = vpack.c.bf16 %v659_v13, %v659_v13  ;;  %v1697_v17 = vpop.f32.mrb[3].mxu0  ;;  %v2663_v33 = vpack.c.bf16 %v722_v30, %v722_v30  ;;  %v1705_v34 = vpop.f32.mrb[3].mxu1 }
 0x1dd   : > { %730 = vst.msk [vmem:[#allocation2] sm:$0xf] %vm729_vm2, %v727_v16  ;;  %758 = vrot.lane.b32.xlu1 %v727_v16, %s2235_s14  ;;  %735 = vrot.lane.b32.xlu0 %v727_v16, %s2236_s12  ;;  %731 = vst.msk [vmem:[#allocation3] sm:$0xf] %vm729_vm2, %v2663_v33 }
 0x1e0   : > { %v832_v19 = vpop.f32.mrb[4].mxu0 }
 0x1e1   : > { %v833_v20 = vadd.f32 %v1629_v18, %v832_v19  ;;  %748 = vrot.lane.b32.xlu0 %v727_v16, %s2237_s2  ;;  %v1712_v21 = vpop.f32.mrb[5].mxu0 }
 0x1e2   : > { %v835_v22 = vpop.f32.mrb[6].mxu0 }
 0x1e3   : > { %v838_v23 = vpack.c.bf16 %v833_v20, %v833_v20  ;;  %v1713_v24 = vpop.f32.mrb[7].mxu0 }
 0x1e4   : > { %v863_v25 = vld [vmem:[#allocation2] sm:$0xf]  ;;  %v867_v50 = vld [vmem:[#allocation3] sm:$0xf] }
 0x1e5   : > { %840 = vst.msk [vmem:[#allocation4] sm:$0xf] %vm729_vm2, %v838_v23  ;;  %849 = vrot.lane.b32.xlu0 %v838_v23, %s2237_s2  ;;  %844 = vrot.lane.b32.xlu1 %v838_v23, %s2236_s12  ;;  %v882_v26 = vsel %vm877_vm3, %v863_v25, 0  ;;  %v1115_v51 = vsel %vm1113_vm4, %v867_v50, 0 }
 0x1e6   : > { %1715 = vmatpush3.bf16.xpose.msra.mxu1 %v882_v26 }
 0x1e7   : > { %1726 = vmatprep.subr.bf16.mxu1 %v2233_v0 }
 0x1e9   : > { %854 = vrot.lane.b32.xlu1 %v838_v23, %s2235_s14 }
 0x1ec   : > { %v859_v27 = vld [vmem:[#allocation4] sm:$0xf] }
 0x1ed   : > { %1717 = vmatmul.mubr.msk.bf16.vlgmr.msra.gmra.mrb[4].mxu1 %vm877_vm3, %v859_v27 }
 0x1ee   : > { %1728 = vmatprep.mubr.msk.bf16.mxu1 %vm2234_vm0, %v2233_v0 }
 0x24f   : > { %v759_v35 = vpop.permute.xlu1 %758  ;;  %v736_v36 = vpop.permute.xlu0 %735 }
 0x250   : > { %762 = vst.msk [vmem:[#allocation2 + $0xc] sm:$0xf] %vm729_vm2, %v759_v35  ;;  %739 = vst.msk [vmem:[#allocation2 + $0x4] sm:$0xf] %vm729_vm2, %v736_v36 }
 0x253   : > { %v749_v37 = vpop.permute.xlu0 %748 }
 0x254   : > { %752 = vst.msk [vmem:[#allocation2 + $0x8] sm:$0xf] %vm729_vm2, %v749_v37 }
 0x257   : > { %v850_v38 = vpop.permute.xlu0 %849  ;;  %v845_v39 = vpop.permute.xlu1 %844  ;;  %v864_v40 = vld [vmem:[#allocation2 + $0x4] sm:$0xf]  ;;  %v866_v45 = vld [vmem:[#allocation2 + $0xc] sm:$0xf] }
 0x258   : > { %853 = vst.msk [vmem:[#allocation4 + $0x8] sm:$0xf] %vm729_vm2, %v850_v38  ;;  %848 = vst.msk [vmem:[#allocation4 + $0x4] sm:$0xf] %vm729_vm2, %v845_v39  ;;  %v928_v41 = vsel %vm877_vm3, %v864_v40, 0  ;;  %v1020_v47 = vsel %vm877_vm3, %v866_v45, 0 }
 0x259   : > { %1721 = vmatpush3.bf16.xpose.msra.mxu0 %v928_v41 }
 0x25a   : > { %1732 = vmatprep.subr.bf16.mxu0 %v2233_v0 }
 0x25b   : > { %v855_v42 = vpop.permute.xlu1 %854  ;;  %v865_v43 = vld [vmem:[#allocation2 + $0x8] sm:$0xf] }
 0x25c   : > { %858 = vst.msk [vmem:[#allocation4 + $0xc] sm:$0xf] %vm729_vm2, %v855_v42  ;;  %v974_v44 = vsel %vm877_vm3, %v865_v43, 0 }
 0x25d   : > { %1727 = vmatpush3.bf16.xpose.msra.mxu1 %v974_v44 }
 0x25e   : > { %1738 = vmatprep.subr.bf16.mxu1 %v2233_v0 }
 0x25f   : > { %v860_v46 = vld [vmem:[#allocation4 + $0x4] sm:$0xf]  ;;  %v861_v48 = vld [vmem:[#allocation4 + $0x8] sm:$0xf] }
 0x260   : > { %1723 = vmatmul.mubr.msk.bf16.vlgmr.msra.gmra.mrb[8].mxu0 %vm877_vm3, %v860_v46 }
 0x261   : > { %1733 = vmatpush3.bf16.xpose.msra.mxu0 %v1020_v47  ;;  %1734 = vmatprep.mubr.msk.bf16.mxu0 %vm2234_vm0, %v2233_v0 }
 0x262   : > { %1744 = vmatprep.subr.bf16.mxu0 %v2233_v0 }
 0x263   : > { %v862_v49 = vld [vmem:[#allocation4 + $0xc] sm:$0xf] }
 0x264   : > { %1729 = vmatmul.mubr.msk.bf16.vlgmr.msra.gmra.mrb[8].mxu1 %vm877_vm3, %v861_v48 }
 0x265   : > { %1740 = vmatprep.mubr.msk.bf16.mxu1 %vm2234_vm0, %v2233_v0  ;;  %1739 = vmatpush3.bf16.msra.mxu1 %v1115_v51 }
 0x266   : > { %1750 = vmatprep.subr.bf16.mxu1 %v2233_v0 }
 0x268   : > { %1735 = vmatmul.mubr.msk.bf16.vlgmr.msra.gmra.mrb[12].mxu0 %vm877_vm3, %v862_v49 }
 0x269   : > { %1746 = vmatprep.mubr.msk.bf16.mxu0 %vm2234_vm0, %v2233_v0 }
 0x2c0   : > { %v918_v53 = vpop.f32.mrb[4].mxu1 }
 0x2c1   : > { %v919_v54 = vadd.f32 %v1634_v52, %v918_v53  ;;  %v1718_v55 = vpop.f32.mrb[5].mxu1 }
 0x2c2   : > { %v921_v56 = vpop.f32.mrb[6].mxu1 }
 0x2c3   : > { %v1719_v57 = vpop.f32.mrb[7].mxu1  ;;  %v1062_v58 = vsel %vm877_vm3, %v919_v54, -inf }
 0x2c4   : > { %1063 = vmax.xlane.f32.xlu0 %v1062_v58 }
 0x333   : > { %v964_v59 = vpop.f32.mrb[8].mxu0 }
 0x334   : > { %v965_v60 = vadd.f32 %v1634_v52, %v964_v59  ;;  %v1724_v61 = vpop.f32.mrb[9].mxu0 }
 0x335   : > { %v967_v62 = vpop.f32.mrb[10].mxu0 }
 0x336   : > { %v1725_v63 = vpop.f32.mrb[11].mxu0  ;;  %v1065_v1 = vsel %vm877_vm3, %v965_v60, -inf }
 0x337   : > { %v1010_v2 = vpop.f32.mrb[8].mxu1  ;;  %1066 = vmax.xlane.f32.xlu1 %v1065_v1 }
 0x338   : > { %v1011_v3 = vadd.f32 %v1634_v52, %v1010_v2  ;;  %v1730_v4 = vpop.f32.mrb[9].mxu1  ;;  %v1904_v2 = vld [vmem:[%s2860_s11] sm:$0xff]  }
 0x339   : > { %v1013_v5 = vpop.f32.mrb[10].mxu1 }
 0x33a   : > { %v1731_v6 = vpop.f32.mrb[11].mxu1  ;;  %v1068_v8 = vsel %vm877_vm3, %v1011_v3, -inf }
 0x33b   : > { %1069 = vmax.xlane.f32.xlu0 %v1068_v8  ;;  %v1056_v9 = vpop.f32.mrb[12].mxu0  ;;  %v1905_v6 = vld [vmem:[%s2860_s11 + $0x8] sm:$0xff]  }
 0x33c   : > { %v1057_v10 = vadd.f32 %v1634_v52, %v1056_v9  ;;  %v1736_v11 = vpop.f32.mrb[13].mxu0 }
 0x33d   : > { %v1059_v12 = vpop.f32.mrb[14].mxu0 }
 0x33e   : > { %v1737_v13 = vpop.f32.mrb[15].mxu0  ;;  %v1071_v14 = vsel %vm877_vm3, %v1057_v10, -inf }
 0x33f   : > { %1072 = vmax.xlane.f32.xlu0 %v1071_v14 }
 0x348   : > { %743 = vrot.lane.b32.xlu1 %v2663_v33, %s2236_s12  ;;  %s1424_s12 = scalar_lea.sflag [#allocation8], %s2590_s9 }
 0x351   : > { %v1064_v15 = vpop.xlane.xlu0 %1063 }
 0x352   : > { %v1074_v16 = vsub.f32 %v919_v54, %v1064_v15 }
 0x354   : > { %v1078_v17 = vmul.f32 1.442695, %v1074_v16 }
 0x356   : > { %1906 = vpow2.f32 %v1078_v17 }
 0x360   : > { %v1907_v18 = vpop.eup %1906 }
 0x361   : > { %v1086_v19 = vsel %vm877_vm3, %v1907_v18, 0.0 }
 0x36c   : > { %1087 = vadd.xlane.f32.xlu1 %v1086_v19 }
 0x3c4   : > { %v1067_v20 = vpop.xlane.xlu1 %1066 }
 0x3c5   : > { %v1075_v21 = vsub.f32 %v965_v60, %v1067_v20 }
 0x3c7   : > { %v1080_v22 = vmul.f32 1.442695, %v1075_v21 }
 0x3c8   : > { %v1070_v23 = vpop.xlane.xlu0 %1069  ;;  %v744_v24 = vpop.permute.xlu1 %743 }
 0x3c9   : > { %1908 = vpow2.f32 %v1080_v22  ;;  %v1076_v25 = vsub.f32 %v1011_v3, %v1070_v23  ;;  %747 = vst.msk [vmem:[#allocation3 + $0x4] sm:$0xf] %vm729_vm2, %v744_v24 }
 0x3cb   : > { %v1082_v26 = vmul.f32 1.442695, %v1076_v25 }
 0x3cc   : > { %v1073_v27 = vpop.xlane.xlu0 %1072 }
 0x3cd   : > { %1910 = vpow2.f32 %v1082_v26  ;;  %v1077_v28 = vsub.f32 %v1057_v10, %v1073_v27 }
 0x3cf   : > { %v1084_v29 = vmul.f32 1.442695, %v1077_v28 }
 0x3d0   : > { %v868_v30 = vld [vmem:[#allocation3 + $0x4] sm:$0xf] }
 0x3d1   : > { %1912 = vpow2.f32 %v1084_v29  ;;  %v1161_v31 = vsel %vm1113_vm4, %v868_v30, 0 }
 0x3d2   : > { %1745 = vmatpush3.bf16.msra.mxu0 %v1161_v31 }
 0x3d3   : > { %v1909_v32 = vpop.eup %1908  ;;  %1756 = vmatprep.subr.bf16.mxu0 %v2233_v0 }
 0x3d4   : > { %v1089_v34 = vsel %vm877_vm3, %v1909_v32, 0.0 }
 0x3d5   : > { %1090 = vadd.xlane.f32.xlu0 %v1089_v34 }
 0x3d7   : > { %v1911_v35 = vpop.eup %1910 }
 0x3d8   : > { %v1092_v36 = vsel %vm877_vm3, %v1911_v35, 0.0 }
 0x3d9   : > { %1093 = vadd.xlane.f32.xlu1 %v1092_v36 }
 0x3db   : > { %v1913_v37 = vpop.eup %1912 }
 0x3dc   : > { %v1095_v38 = vsel %vm877_vm3, %v1913_v37, 0.0 }
 0x3dd   : > { %1096 = vadd.xlane.f32.xlu0 %v1095_v38 }
 0x3ea   : > { %763 = vrot.lane.b32.xlu1 %v2663_v33, %s2235_s14 }
 0x3f3   : > { %753 = vrot.lane.b32.xlu0 %v2663_v33, %s2237_s2  ;;  %s2861_s2 = sld [smem:[#allocation33_spill]] }
 0x3f9   : > { %v1088_v39 = vpop.xlane.xlu1 %1087  ;;  %v1646_v23 = vld [vmem:[%s2861_s2] ss:$0 sm:$0xff]  ;;  %s2124_s2 = scalar_lea.vmem %s2755_s16, 128 }
 0x3fa   : > { %1914 = vrcp.f32 %v1088_v39  ;;  %p2125_p0 = scmp.ne.s32.totalorder %s2755_s16, %s2124_s2  ;;  %p2132_p11 = scmp.lt.s32.totalorder %s2130_s4, %s2124_s2 }
 0x3fc   : > { %p2126_p5 = pnand %p2125_p0, %p2865_p7  ;;  %p2133_p6 = por %p2132_p11, %p2131_p4 }
 0x3fe   : > { %p2127_p2 = pneg %p2126_p5 }
 0x400   : > { %p2134_p10 = pnand %p2133_p6, %p2127_p2 }
 0x404   : > { %v1915_v40 = vpop.eup %1914 }
 0x405   : > { %v1102_v41 = vmul.f32 %v1915_v40, %v1907_v18 }
 0x407   : > { %v1106_v42 = vpack.c.bf16 %v1102_v41, %v1102_v41 }
 0x409   : > { %1741 = vmatmul.mubr.msk.bf16.vlgmr.msra.gmra.mrb[12].mxu1 %vm877_vm3, %v1106_v42  ;;  %v1651_v42 = vld [vmem:[%s2863_s18] ss:$0 sm:$0xff] }
 0x40a   : > { %1752 = vmatprep.mubr.msk.bf16.mxu1 %vm2234_vm0, %v2233_v0 }
 0x462   : > { %v1091_v43 = vpop.xlane.xlu0 %1090 }
 0x463   : > { %1916 = vrcp.f32 %v1091_v43 }
 0x466   : > { %v1094_v44 = vpop.xlane.xlu1 %1093 }
 0x467   : > { %1918 = vrcp.f32 %v1094_v44 }
 0x46a   : > { %v764_v45 = vpop.permute.xlu1 %763  ;;  %v1097_v46 = vpop.xlane.xlu0 %1096 }
 0x46b   : > { %767 = vst.msk [vmem:[#allocation3 + $0xc] sm:$0xf] %vm729_vm2, %v764_v45  ;;  %1920 = vrcp.f32 %v1097_v46 }
 0x46d   : > { %v1917_v33 = vpop.eup %1916 }
 0x46e   : > { %v1103_v47 = vmul.f32 %v1917_v33, %v1909_v32  ;;  %v754_v48 = vpop.permute.xlu0 %753 }
 0x46f   : > { %757 = vst.msk [vmem:[#allocation3 + $0x8] sm:$0xf] %vm729_vm2, %v754_v48 }
 0x470   : > { %v1107_v49 = vpack.c.bf16 %v1103_v47, %v1103_v47 }
 0x471   : > { %v1919_v50 = vpop.eup %1918 }
 0x472   : > { %1747 = vmatmul.mubr.msk.bf16.vlgmr.msra.gmra.mrb[16].mxu0 %vm877_vm3, %v1107_v49  ;;  %v870_v51 = vld [vmem:[#allocation3 + $0xc] sm:$0xf]  ;;  %v1104_v54 = vmul.f32 %v1919_v50, %v1911_v35 }
 0x473   : > { %v1253_v52 = vsel %vm1113_vm4, %v870_v51, 0  ;;  %1758 = vmatprep.mubr.msk.bf16.mxu0 %vm2234_vm0, %v2233_v0 }
 0x474   : > { %1757 = vmatpush3.bf16.msra.mxu0 %v1253_v52  ;;  %v1108_v59 = vpack.c.bf16 %v1104_v54, %v1104_v54 }
 0x475   : > { %v1921_v53 = vpop.eup %1920 }
 0x476   : > { %v1105_v55 = vmul.f32 %v1921_v53, %v1913_v37  ;;  %v869_v56 = vld [vmem:[#allocation3 + $0x8] sm:$0xf] }
 0x477   : > { %v1207_v57 = vsel %vm1113_vm4, %v869_v56, 0 }
 0x478   : > { %1751 = vmatpush3.bf16.msra.mxu1 %v1207_v57  ;;  %v1109_v58 = vpack.c.bf16 %v1105_v55, %v1105_v55 }
 0x479   : > { %1762 = vmatprep.subr.bf16.mxu1 %v2233_v0 }
 0x47a   : > { %1759 = vmatmul.mubr.msk.bf16.vlgmr.msra.gmra.mrb[20].mxu0 %vm877_vm3, %v1109_v58 }
 0x47b   : > { %1753 = vmatmul.mubr.msk.bf16.vlgmr.msra.gmra.mrb[16].mxu1 %vm877_vm3, %v1108_v59 }
 0x47c   : > { %1766 = vmatprep.mubr.msk.bf16.mxu1 %vm2234_vm0, %v2233_v0  ;;  %1763 = vmatpush3.bf16.msra.mxu1 %v1904_v2 }
 0x47d   : > { %1764 = vmatprep.subr.bf16.mxu1 %v2233_v0 }
 0x480   : > { %1765 = vmatpush3.bf16.msra.mxu1 %v1905_v6 }
 0x4dc   : > { %v1151_v60 = vpop.f32.mrb[12].mxu1 }
 0x4dd   : > { %v1295_v61 = vpack.c.bf16 %v1151_v60, %v1151_v60  ;;  %v1742_v62 = vpop.f32.mrb[13].mxu1 }
 0x4de   : > { %v1154_v63 = vpop.f32.mrb[14].mxu1 }
 0x4df   : > { %1299 = vst.msk [vmem:[#allocation5] sm:$0xf] %vm729_vm2, %v1295_v61  ;;  %v1743_v1 = vpop.f32.mrb[15].mxu1 }
 0x545   : > { %v1197_v3 = vpop.f32.mrb[16].mxu0 }
 0x546   : > { %v1659_v4 = vpack.c.bf16 %v1197_v3, %v1197_v3  ;;  %v1748_v5 = vpop.f32.mrb[17].mxu0 }
 0x547   : > { %v1200_v8 = vpop.f32.mrb[18].mxu0 }
 0x548   : > { %1303 = vrot.lane.b32.xlu1 %v1659_v4, %s2238_s7  ;;  %v1749_v9 = vpop.f32.mrb[19].mxu0 }
 0x54d   : > { %v1289_v10 = vpop.f32.mrb[20].mxu0 }
 0x54e   : > { %v1661_v11 = vpack.c.bf16 %v1289_v10, %v1289_v10  ;;  %v1243_v12 = vpop.f32.mrb[16].mxu1  ;;  %v1760_v13 = vpop.f32.mrb[21].mxu0 }
 0x54f   : > { %v1660_v14 = vpack.c.bf16 %v1243_v12, %v1243_v12  ;;  %v1754_v15 = vpop.f32.mrb[17].mxu1  ;;  %v1292_v16 = vpop.f32.mrb[22].mxu0 }
 0x550   : > { %v1246_v17 = vpop.f32.mrb[18].mxu1  ;;  %1319 = vrot.lane.b32.xlu1 %v1661_v11, %s2239_s23  ;;  %v1761_v18 = vpop.f32.mrb[23].mxu0 }
 0x551   : > { %1311 = vrot.lane.b32.xlu0 %v1660_v14, %s2240_s19  ;;  %v1755_v19 = vpop.f32.mrb[19].mxu1  ;;  %s2864_s19 = sld [smem:[#allocation36_spill]] }
 0x557   : > { %s2753_s14 = scalar_lea.hbm %s2864_s19, %s1653_s15 }
 0x5ba   : > { %v1304_v0 = vpop.permute.xlu1 %1303 }
 0x5bb   : > { %1307 = vst.msk [vmem:[#allocation5] sm:$0xf] %vm1306_vm5, %v1304_v0 }
 0x5c2   : > { %v1320_v21 = vpop.permute.xlu1 %1319 }
 0x5c3   : > { %v1312_v20 = vpop.permute.xlu0 %1311 }
 0x5c4   : > { %1315 = vst.msk [vmem:[#allocation5] sm:$0xf] %vm1314_vm6, %v1312_v20 }
 0x5c5   : > { %1323 = vst.msk [vmem:[#allocation5] sm:$0xf] %vm1322_vm7, %v1320_v21 }
 0x5cc   : > { %v1324_v22 = vld [vmem:[#allocation5] sm:$0xf] }
 0x5cd   : > { %1767 = vmatmul.mubr.msk.bf16.vlgmr.msra.gmra.mrb[20].mxu1 %vm620_vm1, %v1324_v22 }
 0x6a0   : > { %v1385_v24 = vpop.f32.mrb[20].mxu1 }
 0x6a1   : > { %v1386_v25 = vadd.f32 %v1646_v23, %v1385_v24  ;;  %v1768_v26 = vpop.f32.mrb[21].mxu1 }
 0x6a2   : > { %v1388_v27 = vpop.f32.mrb[22].mxu1 }
 0x6a3   : > { %v1769_v28 = vpop.f32.mrb[23].mxu1  ;;  %v1391_v29 = vadd.f32 %v1386_v25, %v2636_v7  ;;  %v1650_v7 = vld [vmem:[%s2862_s28] ss:$0 sm:$0xff] }
 0x6a5   : > { %v1392_v30 = vsel %vm620_vm1, %v1391_v29, 0.0 }
 0x6a6   : > { %1393 = vadd.xlane.f32.xlu0 %v1392_v30 }
 0x733   : > { %v1394_v31 = vpop.xlane.xlu0 %1393 }
 0x734   : > { %v1396_v32 = vmul.f32 0.03125, %v1394_v31 }
 0x736   : > { %v1397_v34 = vsub.f32 %v1391_v29, %v1396_v32 }
 0x738   : > { %v1398_v35 = vmul.f32 %v1397_v34, %v1397_v34 }
 0x73a   : > { %v1399_v36 = vsel %vm620_vm1, %v1398_v35, 0.0 }
 0x73b   : > { %1400 = vadd.xlane.f32.xlu1 %v1399_v36 }
 0x7c8   : > { %v1401_v37 = vpop.xlane.xlu1 %1400 }
 0x7c9   : > { %v1402_v38 = vmul.f32 0.03125, %v1401_v37 }
 0x7cb   : > { %v1403_v39 = vadd.f32 1e-12, %v1402_v38 }
 0x7cd   : > { %1922 = vrsqrt.f32 %v1403_v39 }
 0x7d7   : > { %v1923_v40 = vpop.eup %1922 }
 0x7d8   : > { %v1405_v41 = vmul.f32 %v1923_v40, %v1397_v34 }
 0x7da   : > { %v1413_v43 = vmul.f32 %v1650_v7, %v1405_v41 }
 0x7dc   : > { %v1421_v44 = vadd.f32 %v1651_v42, %v1413_v43 }
 0x7de   : > { %1422 = vst.msk [vmem:[%s586_s17] sm:$0xff] %vm620_vm1, %v1421_v44 }
 0x7df   : > { %2137 = shalt.err (!%p2134_p10)
}
 0x7e0   : > { %s2138_s9 = scalar_lea.hbm %s2753_s14, 128  ;;  %s2142_s22 = scalar_lea.hbm %s2864_s19, 256 }
 0x7e1   : > { %p2139_p1 = scmp.ne.s32.totalorder %s2753_s14, %s2138_s9  ;;  %p2143_p3 = scmp.lt.u32.totalorder %s2753_s14, %s2864_s19 }
 0x7e2   : > { %p2144_p12 = scmp.lt.u32.totalorder %s2142_s22, %s2138_s9  ;;  %p2146_p0 = scmp.lt.u32.totalorder %s2138_s9, %s2753_s14 }
 0x7e3   : > { %p2140_p9 = pnand %p2139_p1, %p2865_p7 }
 0x7e4   : > { %p2145_p13 = por %p2144_p12, %p2143_p3 }
 0x7e5   : > { %p2141_p8 = pneg %p2140_p9 }
 0x7e6   : > { %p2147_p5 = por %p2146_p0, %p2145_p13 }
 0x7e8   : > { %p2148_p2 = pnand %p2147_p5, %p2141_p8 }
 0x7ea   : > { %2151 = shalt.err (!%p2148_p2)
}
 0x7eb   : > { %1794 = dma.vmem_to_hbm [thread:$0]  (%p2865_p7), %s2755_s16, 128, %s2753_s14, %s1424_s12  }
 0x7ec PF: > { %s1450_s15 = sand.u32 1, %s2202_s25   ;;  %p2866_p4 = scmp.ne.s32.totalorder %s2848_s24, 0 }
 0x7ed   : > { %p2867_p11 = scmp.ge.s32.totalorder %s2222_s30, 2  ;;  %s1451_s17 = scalar_lea.sflag [#allocation8], %s1450_s15 }
 0x7ef   : > { %p1820_p6 = pnand %p2867_p11, %p2866_p4 }
 0x7f1   : > { %2197 = dma.done.wait (!%p1820_p6), %s1451_s17, 128  }
 0x7f2   : > { %2199 = vsyncadd (!%p1820_p6), %s1451_s17, 4294967168  ;;  %s34_s30 = sadd.s32 1, %s2222_s30   ;;  %s2868_s25 = smov %s2206_s26 }
 0x7f3   : > { %p31_p10 = scmp.ge.s32.totalorder %s34_s30, 4   ;;  %s2869_s26 = smov %s2210_s27 }
 0x7f4   : > { %s2870_s27 = smov %s2510_s10  ;;  %s2871_s28 = smov %s2218_s29 }
 0x7f5   : > { %s2872_s29 = smov %s2874_s13  ;;  %33 = sbr.rel (!%p31_p10) target bundleno = 22 (0x16), region = 166 }
 0x7fc   :  { %1456 = vsyncpa [#allocation7], 1 }
 0x7fd   :  { %1458 = vsyncpa [#allocation7 + $0x1], 1 }
 0x7fe   :  { %1459 = vsyncpa [#allocation10], 1 }
 0x7ff   :  { %1461 = vsyncpa [#allocation10 + $0x1], 1 }
 0x800   :  { %1462 = vsyncpa [#allocation13], 1 }
 0x801   :  { %1463 = vsyncpa [#allocation16], 1 }
 0x802   :  { %1464 = vsyncpa [#allocation8], 1 }
 0x803   :  { %1466 = vsyncpa [#allocation8 + $0x1], 1 }

</bundles_post_ra>
